<compile_context>
chip_gen: v5e
topology: v5e:2x2
jax: 0.10.0
libtpu: 0.0.40
codegen_flags: <defaults>
</compile_context>

<pallas_src>
import functools

import numpy as np

import jax
import jax.numpy as jnp
from jax import lax
from jax.experimental import pallas as pl
from jax.experimental.pallas import tpu as pltpu


# -----------------------------------------------------------------------------
# Pallas kernel
# -----------------------------------------------------------------------------
def _make_yolo_loss_kernel(*, S, n_cls, chunks_per_tile, cl):
    inv_S = 1.0 / float(S)
    EPS = 1e-9          # keeps zero-area padded / empty cells at iou == 0
    BOX = 5             # x, y, w, h, conf

    def corners(x, y, w, h):
        cx = x * inv_S
        cy = y * inv_S
        return cx - 0.5 * w, cy - 0.5 * h, cx + 0.5 * w, cy + 0.5 * h

    def kernel(pred_ref, tbox_ref, tcls_ref, mask_ref, out_ref):
        # out_ref: resident per-core accumulator (4, 8, cl) f32
        #   rows: 0 cls, 1 noobj-conf (both boxes), 2 regression, 3 contain-conf
        f32 = jnp.float32

        @pl.when(pl.program_id(1) == 0)
        def _init():
            out_ref[...] = jnp.zeros_like(out_ref)

        def chunk(ci, carry):
            cls_a, noobj_a, reg_a, conf_a = carry

            def p(k):                        # predicted feature row -> (8, cl) f32
                return pred_ref[k, ci].astype(f32)

            def t(k):                        # target-box feature row -> (8, cl) f32
                return tbox_ref[k, ci].astype(f32)

            m = mask_ref[0, ci].astype(f32)              # (8, cl) in {0, 1}
            m_b = m > 0.5
            nm = 1.0 - m

            # ---- class prediction loss: unrolled running sum over classes ----
            cls_p = jnp.zeros_like(m)
            for k in range(n_cls):
                d = pred_ref[2 * BOX + k, ci].astype(f32) - tcls_ref[k, ci].astype(f32)
                cls_p = cls_p + d * d
            cls_p = cls_p * m

            # ---- no-object confidence loss (both predicted boxes) ------------
            c1 = p(4)
            c2 = p(9)
            noobj_p = (c1 * c1 + c2 * c2) * nm

            # ---- per-cell best-IoU box selection ------------------------------
            tx, ty, tw, th = t(0), t(1), t(2), t(3)
            tx1, ty1, tx2, ty2 = corners(tx, ty, tw, th)
            t_area = (tx2 - tx1) * (ty2 - ty1)

            def inter_and_denom(x, y, w, h):
                ax1, ay1, ax2, ay2 = corners(x, y, w, h)
                iw = jnp.maximum(jnp.minimum(ax2, tx2) - jnp.maximum(ax1, tx1), 0.0)
                ih = jnp.maximum(jnp.minimum(ay2, ty2) - jnp.maximum(ay1, ty1), 0.0)
                inter = iw * ih
                area = (ax2 - ax1) * (ay2 - ay1)
                return inter, area + t_area - inter + EPS

            x1, y1, w1, h1 = p(0), p(1), p(2), p(3)
            x2, y2, w2, h2 = p(5), p(6), p(7), p(8)

            i1, d1 = inter_and_denom(x1, y1, w1, h1)
            i2, d2 = inter_and_denom(x2, y2, w2, h2)
            # Divide-free selection (denoms > 0 for non-degenerate boxes),
            # then a single divide per cell for the selected IoU.
            sel1 = i1 * d2 > i2 * d1
            best_iou = jnp.where(sel1, i1, i2) / jnp.where(sel1, d1, d2)

            bx = jnp.where(sel1, x1, x2)
            by = jnp.where(sel1, y1, y2)
            bw = jnp.where(sel1, w1, w2)
            bh = jnp.where(sel1, h1, h2)
            bc = jnp.where(sel1, c1, c2)

            # ---- regression loss (reference sqrt's x,y -- not w,h) -----------
            # (sqrt(a) - sqrt(b))^2 == a + b - 2*sqrt(a*b): 2 sqrts/cell not 4.
            reg_p = (bx + tx - 2.0 * jnp.sqrt(bx * tx) +
                     by + ty - 2.0 * jnp.sqrt(by * ty) +
                     (bw - tw) ** 2 + (bh - th) ** 2)
            reg_p = jnp.where(m_b, reg_p, 0.0)

            # ---- containing-object confidence loss ---------------------------
            conf_p = jnp.where(m_b, (bc - best_iou) ** 2, 0.0)

            return (cls_a + cls_p, noobj_a + noobj_p,
                    reg_a + reg_p, conf_a + conf_p)

        zero = jnp.zeros((8, cl), f32)
        cls_a, noobj_a, reg_a, conf_a = lax.fori_loop(
            0, chunks_per_tile, chunk, (zero, zero, zero, zero))

        # One elementwise += per grid step into the resident accumulator block.
        out_ref[0] += cls_a
        out_ref[1] += noobj_a
        out_ref[2] += reg_a
        out_ref[3] += conf_a

    return kernel


# -----------------------------------------------------------------------------
# Wrapper: layout plumbing, tiling, and the tiny final scalar normalisations
# -----------------------------------------------------------------------------
@functools.partial(
    jax.jit,
    static_argnames=("S", "B", "l_coord", "l_noobj", "compute_dtype"))
def yolo_loss_pallas(pred_tensor, target_boxes, target_cls, has_object_map, *,
                     S, B=2, l_coord=5.0, l_noobj=0.5,
                     compute_dtype=jnp.bfloat16):
    assert B == 2, "kernel is written for B == 2 (as in the reference module)"
    N = pred_tensor.shape[0]
    n_feat = pred_tensor.shape[-1]
    n_cls = n_feat - 5 * B                       # 20
    M = N * S * S
    cd = np.dtype(compute_dtype)

    # ---- lane-dense (feature, cell) layout; dtype cast fused into transpose --
    # TODO(synk): this transpose+pad is still one HBM->HBM pre-pass over all 55
    # feature rows; emitting the prediction tensor in (feature, cell) layout
    # upstream would remove it entirely.
    predT = jnp.transpose(pred_tensor.reshape(M, n_feat).astype(cd))      # (30, M)
    tboxT = jnp.transpose(target_boxes.reshape(M, 4).astype(cd))          # (4, M)
    tclsT = jnp.transpose(target_cls.reshape(M, n_cls).astype(cd))        # (20, M)
    maskT = has_object_map.reshape(1, M).astype(cd)                       # (1, M)

    # ---- tiling --------------------------------------------------------------
    CL = 256                                 # lanes per chunk (2 f32 vregs / row)
    CELLS_PER_CHUNK = 8 * CL                 # 8 sublanes folded -> 2048 cells
    # ~3.6 MB of input per grid step regardless of streaming dtype.
    max_cpt = 16 if cd.itemsize <= 2 else 8
    NCORES = 2                               # v7x megacore split; harmless elsewhere

    n_chunks = pl.cdiv(M, CELLS_PER_CHUNK)
    cpt = max(1, min(max_cpt, pl.cdiv(n_chunks, NCORES)))   # chunks per grid step
    n_tiles = pl.cdiv(n_chunks, cpt)
    n_cores = min(NCORES, n_tiles)
    tiles_per_core = pl.cdiv(n_tiles, n_cores)
    total_chunks = n_cores * tiles_per_core * cpt
    Mp = total_chunks * CELLS_PER_CHUNK

    def prep(x):
        pad = Mp - M
        if pad:
            x = jnp.pad(x, ((0, 0), (0, pad)))   # zero-pad => zero loss contribution
        # pure trailing-dim split: cell -> (chunk, sublane, lane)
        return x.reshape(x.shape[0], total_chunks, 8, CL)

    pred_a = prep(predT)
    tbox_a = prep(tboxT)
    tcls_a = prep(tclsT)
    mask_a = prep(maskT)

    def in_map(c, i):
        return (0, c * tiles_per_core + i, 0, 0)

    kernel = _make_yolo_loss_kernel(S=S, n_cls=n_cls, chunks_per_tile=cpt, cl=CL)

    acc = pl.pallas_call(
        kernel,
        out_shape=jax.ShapeDtypeStruct((n_cores * 4, 8, CL), jnp.float32),
        grid_spec=pltpu.PrefetchScalarGridSpec(
            num_scalar_prefetch=0,
            grid=(n_cores, tiles_per_core),
            in_specs=[
                pl.BlockSpec((n_feat, cpt, 8, CL), in_map),   # pred (boxes + cls)
                pl.BlockSpec((4, cpt, 8, CL), in_map),        # target boxes
                pl.BlockSpec((n_cls, cpt, 8, CL), in_map),    # target classes
                pl.BlockSpec((1, cpt, 8, CL), in_map),        # object mask
            ],
            out_specs=pl.BlockSpec((4, 8, CL), lambda c, i: (c, 0, 0)),
        ),
        compiler_params=pltpu.CompilerParams(
            dimension_semantics=("parallel", "arbitrary"),
            vmem_limit_bytes=32 * 1024 * 1024),
    )(pred_a, tbox_a, tcls_a, mask_a)

    # One tiny cross-cell reduction + the scalar normalisations in plain JAX.
    sums = jnp.sum(acc.reshape(n_cores, 4, 8, CL), axis=(0, 2, 3))   # (4,)

    n_obj = jnp.sum(has_object_map.astype(jnp.float32))
    n_noobj = jnp.float32(M) - n_obj

    cls_loss = sums[0] / N
    no_obj_loss = l_noobj * sums[1] / n_noobj
    reg_loss = l_coord * sums[2] / n_obj
    conf_loss = sums[3] / n_obj
    total = reg_loss + conf_loss + no_obj_loss + cls_loss

    return {
        "total_loss": total,
        "reg_loss": reg_loss,
        "containing_obj_loss": conf_loss,
        "no_obj_loss": no_obj_loss,
        "cls_loss": cls_loss,
    }


# -----------------------------------------------------------------------------
# Pure-JAX reference (same semantics as the PyTorch module's forward)
# -----------------------------------------------------------------------------
def yolo_loss_ref(pred_tensor, target_boxes, target_cls, has_object_map,
                  *, S, l_coord=5.0, l_noobj=0.5):
    N = pred_tensor.shape[0]
    M = N * S * S
    pred = pred_tensor.reshape(M, -1).astype(jnp.float32)
    tbox = target_boxes.reshape(M, 4).astype(jnp.float32)
    tcls = target_cls.reshape(M, -1).astype(jnp.float32)
    m = has_object_map.reshape(M).astype(jnp.float32)
    m_b = m > 0.5

    cls_loss = jnp.sum(((pred[:, 10:] - tcls) ** 2) * m[:, None]) / N

    n_noobj = jnp.sum(1.0 - m)
    no_obj_loss = l_noobj * (jnp.sum(pred[:, 4] ** 2 * (1.0 - m)) +
                             jnp.sum(pred[:, 9] ** 2 * (1.0 - m))) / n_noobj

    def xyxy(b):
        x, y, w, h = b[:, 0], b[:, 1], b[:, 2], b[:, 3]
        return jnp.stack([x / S - 0.5 * w, y / S - 0.5 * h,
                          x / S + 0.5 * w, y / S + 0.5 * h], axis=1)

    def diag_iou(a, b):
        lt = jnp.maximum(a[:, :2], b[:, :2])
        rb = jnp.minimum(a[:, 2:], b[:, 2:])
        wh = jnp.maximum(rb - lt, 0.0)
        inter = wh[:, 0] * wh[:, 1]
        a1 = (a[:, 2] - a[:, 0]) * (a[:, 3] - a[:, 1])
        a2 = (b[:, 2] - b[:, 0]) * (b[:, 3] - b[:, 1])
        return inter / (a1 + a2 - inter)

    t_xy = xyxy(tbox)
    i1 = diag_iou(xyxy(pred[:, 0:4]), t_xy)
    i2 = diag_iou(xyxy(pred[:, 5:9]), t_xy)
    sel = i1 > i2
    best_iou = jnp.maximum(i1, i2)
    best = jnp.where(sel[:, None], pred[:, 0:5], pred[:, 5:10])
    n_obj = jnp.sum(m)

    reg_row = ((jnp.sqrt(best[:, 0]) - jnp.sqrt(tbox[:, 0])) ** 2 +
               (jnp.sqrt(best[:, 1]) - jnp.sqrt(tbox[:, 1])) ** 2 +
               (best[:, 2] - tbox[:, 2]) ** 2 + (best[:, 3] - tbox[:, 3]) ** 2)
    reg_loss = l_coord * jnp.sum(jnp.where(m_b, reg_row, 0.0)) / n_obj
    conf_row = (best[:, 4] - best_iou) ** 2
    conf_loss = jnp.sum(jnp.where(m_b, conf_row, 0.0)) / n_obj

    total = reg_loss + conf_loss + no_obj_loss + cls_loss
    return {
        "total_loss": total,
        "reg_loss": reg_loss,
        "containing_obj_loss": conf_loss,
        "no_obj_loss": no_obj_loss,
        "cls_loss": cls_loss,
    }


# -----------------------------------------------------------------------------
if __name__ == "__main__":
    S, B, l_coord, l_noobj = 4, 2, 5.0, 0.5
    N = 2

    key = jax.random.PRNGKey(0)
    k1, k2, k3, k4 = jax.random.split(key, 4)

    # positive values keep sqrt(x), sqrt(y) real, like well-behaved YOLO preds
    pred_tensor = jax.random.uniform(k1, (N, S, S, B * 5 + 20),
                                     dtype=jnp.float32, minval=0.05, maxval=1.0)
    target_boxes = jax.random.uniform(k2, (N, S, S, 4),
                                      dtype=jnp.float32, minval=0.05, maxval=1.0)
    target_cls = jax.random.uniform(k3, (N, S, S, 20), dtype=jnp.float32)
    has_object_map = jax.random.bernoulli(k4, 0.4, (N, S, S))
    # guarantee at least one object cell and one empty cell
    has_object_map = has_object_map.at[0, 0, 0].set(True)
    has_object_map = has_object_map.at[0, 0, 1].set(False)

    # ---- bf16-streaming kernel vs reference on identically rounded inputs ----
    out_bf16 = yolo_loss_pallas(pred_tensor, target_boxes, target_cls,
                                has_object_map, S=S, B=B,
                                l_coord=l_coord, l_noobj=l_noobj,
                                compute_dtype=jnp.bfloat16)
    out_bf16 = jax.tree_util.tree_map(jax.block_until_ready, out_bf16)

    rd = lambda x: x.astype(jnp.bfloat16).astype(jnp.float32)
    ref_bf16 = yolo_loss_ref(rd(pred_tensor), rd(target_boxes), rd(target_cls),
                             has_object_map, S=S,
                             l_coord=l_coord, l_noobj=l_noobj)
    for k in out_bf16:
        assert jnp.allclose(out_bf16[k], ref_bf16[k], rtol=1e-4, atol=1e-4), (
            k, out_bf16[k], ref_bf16[k])

    # ---- f32-streaming kernel vs full-precision reference --------------------
    out_f32 = yolo_loss_pallas(pred_tensor, target_boxes, target_cls,
                               has_object_map, S=S, B=B,
                               l_coord=l_coord, l_noobj=l_noobj,
                               compute_dtype=jnp.float32)
    out_f32 = jax.tree_util.tree_map(jax.block_until_ready, out_f32)
    ref_f32 = yolo_loss_ref(pred_tensor, target_boxes, target_cls,
                            has_object_map, S=S,
                            l_coord=l_coord, l_noobj=l_noobj)
    for k in out_f32:
        assert jnp.allclose(out_f32[k], ref_f32[k], rtol=1e-4, atol=1e-4), (
            k, out_f32[k], ref_f32[k])

    print("KERNEL_OK")
</pallas_src>

<mosaic_0001>
module attributes {stable_mosaic.version = 11 : i64} {
  func.func @kernel(%arg0: i32, %arg1: i32, %arg2: memref<30x1x8x256xbf16, #tpu.memory_space<vmem>>, %arg3: memref<4x1x8x256xbf16, #tpu.memory_space<vmem>>, %arg4: memref<20x1x8x256xbf16, #tpu.memory_space<vmem>>, %arg5: memref<1x1x8x256xbf16, #tpu.memory_space<vmem>>, %arg6: memref<4x8x256xf32, #tpu.memory_space<vmem>>) attributes {dimension_semantics = [#tpu.dimension_semantics<parallel>, #tpu.dimension_semantics<arbitrary>], iteration_bounds = array<i64: 1, 1>, scalar_prefetch = 0 : i64, scratch_operands = 0 : i64, tpu.core_type = #tpu.core_type<tc>, window_params = [{transform_indices = @transform_0, window_bounds = array<i64: 30, 1, 8, 256>}, {transform_indices = @transform_1, window_bounds = array<i64: 4, 1, 8, 256>}, {transform_indices = @transform_2, window_bounds = array<i64: 20, 1, 8, 256>}, {transform_indices = @transform_3, window_bounds = array<i64: 1, 1, 8, 256>}, {transform_indices = @transform_4, window_bounds = array<i64: 4, 8, 256>}]} {
    %c0_i32 = arith.constant 0 : i32
    %0 = arith.cmpi eq, %arg1, %c0_i32 : i32
    %1 = arith.extui %0 : i1 to i32
    %c0_i32_0 = arith.constant 0 : i32
    %2 = arith.cmpi ne, %1, %c0_i32_0 : i32
    scf.if %2 {
      %cst_192 = arith.constant 0.000000e+00 : f32
      %445 = vector.broadcast %cst_192 : f32 to vector<4x8x256xf32>
      %c0_193 = arith.constant 0 : index
      %c0_194 = arith.constant 0 : index
      %c0_195 = arith.constant 0 : index
      %446 = vector.load %arg6[%c0_193, %c0_194, %c0_195] : memref<4x8x256xf32, #tpu.memory_space<vmem>>, vector<4x8x256xf32>
      tpu.vector_store %arg6[%c0_193, %c0_194, %c0_195], %445 {strides = array<i32>} : memref<4x8x256xf32, #tpu.memory_space<vmem>>, vector<4x8x256xf32>,
    } else {
    }
    %cst = arith.constant 0.000000e+00 : f32
    %3 = vector.broadcast %cst : f32 to vector<8x256xf32>
    %c0_i32_1 = arith.constant 0 : i32
    %c0 = arith.constant 0 : index
    %4 = arith.index_cast %c0_i32_1 : i32 to index
    %c0_2 = arith.constant 0 : index
    %c0_3 = arith.constant 0 : index
    %5 = vector.load %arg5[%c0, %4, %c0_2, %c0_3] : memref<1x1x8x256xbf16, #tpu.memory_space<vmem>>, vector<1x1x8x256xbf16>
    %6 = vector.shape_cast %5 : vector<1x1x8x256xbf16> to vector<8x256xbf16>
    %7 = arith.extf %6 : vector<8x256xbf16> to vector<8x256xf32>
    %cst_4 = arith.constant 5.000000e-01 : f32
    %8 = vector.broadcast %cst_4 : f32 to vector<8x256xf32>
    %9 = arith.cmpf ogt, %7, %8 : vector<8x256xf32>
    %cst_5 = arith.constant 1.000000e+00 : f32
    %10 = vector.broadcast %cst_5 : f32 to vector<8x256xf32>
    %11 = arith.subf %10, %7 : vector<8x256xf32>
    %cst_6 = arith.constant 0.000000e+00 : f32
    %12 = vector.broadcast %cst_6 : f32 to vector<8x256xf32>
    %c10 = arith.constant 10 : index
    %13 = arith.index_cast %c0_i32_1 : i32 to index
    %c0_7 = arith.constant 0 : index
    %c0_8 = arith.constant 0 : index
    %14 = vector.load %arg2[%c10, %13, %c0_7, %c0_8] : memref<30x1x8x256xbf16, #tpu.memory_space<vmem>>, vector<1x1x8x256xbf16>
    %15 = vector.shape_cast %14 : vector<1x1x8x256xbf16> to vector<8x256xbf16>
    %16 = arith.extf %15 : vector<8x256xbf16> to vector<8x256xf32>
    %c0_9 = arith.constant 0 : index
    %17 = arith.index_cast %c0_i32_1 : i32 to index
    %c0_10 = arith.constant 0 : index
    %c0_11 = arith.constant 0 : index
    %18 = vector.load %arg4[%c0_9, %17, %c0_10, %c0_11] : memref<20x1x8x256xbf16, #tpu.memory_space<vmem>>, vector<1x1x8x256xbf16>
    %19 = vector.shape_cast %18 : vector<1x1x8x256xbf16> to vector<8x256xbf16>
    %20 = arith.extf %19 : vector<8x256xbf16> to vector<8x256xf32>
    %21 = arith.subf %16, %20 : vector<8x256xf32>
    %22 = arith.mulf %21, %21 : vector<8x256xf32>
    %23 = arith.addf %12, %22 : vector<8x256xf32>
    %c11 = arith.constant 11 : index
    %24 = arith.index_cast %c0_i32_1 : i32 to index
    %c0_12 = arith.constant 0 : index
    %c0_13 = arith.constant 0 : index
    %25 = vector.load %arg2[%c11, %24, %c0_12, %c0_13] : memref<30x1x8x256xbf16, #tpu.memory_space<vmem>>, vector<1x1x8x256xbf16>
    %26 = vector.shape_cast %25 : vector<1x1x8x256xbf16> to vector<8x256xbf16>
    %27 = arith.extf %26 : vector<8x256xbf16> to vector<8x256xf32>
    %c1 = arith.constant 1 : index
    %28 = arith.index_cast %c0_i32_1 : i32 to index
    %c0_14 = arith.constant 0 : index
    %c0_15 = arith.constant 0 : index
    %29 = vector.load %arg4[%c1, %28, %c0_14, %c0_15] : memref<20x1x8x256xbf16, #tpu.memory_space<vmem>>, vector<1x1x8x256xbf16>
    %30 = vector.shape_cast %29 : vector<1x1x8x256xbf16> to vector<8x256xbf16>
    %31 = arith.extf %30 : vector<8x256xbf16> to vector<8x256xf32>
    %32 = arith.subf %27, %31 : vector<8x256xf32>
    %33 = arith.mulf %32, %32 : vector<8x256xf32>
    %34 = arith.addf %23, %33 : vector<8x256xf32>
    %c12 = arith.constant 12 : index
    %35 = arith.index_cast %c0_i32_1 : i32 to index
    %c0_16 = arith.constant 0 : index
    %c0_17 = arith.constant 0 : index
    %36 = vector.load %arg2[%c12, %35, %c0_16, %c0_17] : memref<30x1x8x256xbf16, #tpu.memory_space<vmem>>, vector<1x1x8x256xbf16>
    %37 = vector.shape_cast %36 : vector<1x1x8x256xbf16> to vector<8x256xbf16>
    %38 = arith.extf %37 : vector<8x256xbf16> to vector<8x256xf32>
    %c2 = arith.constant 2 : index
    %39 = arith.index_cast %c0_i32_1 : i32 to index
    %c0_18 = arith.constant 0 : index
    %c0_19 = arith.constant 0 : index
    %40 = vector.load %arg4[%c2, %39, %c0_18, %c0_19] : memref<20x1x8x256xbf16, #tpu.memory_space<vmem>>, vector<1x1x8x256xbf16>
    %41 = vector.shape_cast %40 : vector<1x1x8x256xbf16> to vector<8x256xbf16>
    %42 = arith.extf %41 : vector<8x256xbf16> to vector<8x256xf32>
    %43 = arith.subf %38, %42 : vector<8x256xf32>
    %44 = arith.mulf %43, %43 : vector<8x256xf32>
    %45 = arith.addf %34, %44 : vector<8x256xf32>
    %c13 = arith.constant 13 : index
    %46 = arith.index_cast %c0_i32_1 : i32 to index
    %c0_20 = arith.constant 0 : index
    %c0_21 = arith.constant 0 : index
    %47 = vector.load %arg2[%c13, %46, %c0_20, %c0_21] : memref<30x1x8x256xbf16, #tpu.memory_space<vmem>>, vector<1x1x8x256xbf16>
    %48 = vector.shape_cast %47 : vector<1x1x8x256xbf16> to vector<8x256xbf16>
    %49 = arith.extf %48 : vector<8x256xbf16> to vector<8x256xf32>
    %c3 = arith.constant 3 : index
    %50 = arith.index_cast %c0_i32_1 : i32 to index
    %c0_22 = arith.constant 0 : index
    %c0_23 = arith.constant 0 : index
    %51 = vector.load %arg4[%c3, %50, %c0_22, %c0_23] : memref<20x1x8x256xbf16, #tpu.memory_space<vmem>>, vector<1x1x8x256xbf16>
    %52 = vector.shape_cast %51 : vector<1x1x8x256xbf16> to vector<8x256xbf16>
    %53 = arith.extf %52 : vector<8x256xbf16> to vector<8x256xf32>
    %54 = arith.subf %49, %53 : vector<8x256xf32>
    %55 = arith.mulf %54, %54 : vector<8x256xf32>
    %56 = arith.addf %45, %55 : vector<8x256xf32>
    %c14 = arith.constant 14 : index
    %57 = arith.index_cast %c0_i32_1 : i32 to index
    %c0_24 = arith.constant 0 : index
    %c0_25 = arith.constant 0 : index
    %58 = vector.load %arg2[%c14, %57, %c0_24, %c0_25] : memref<30x1x8x256xbf16, #tpu.memory_space<vmem>>, vector<1x1x8x256xbf16>
    %59 = vector.shape_cast %58 : vector<1x1x8x256xbf16> to vector<8x256xbf16>
    %60 = arith.extf %59 : vector<8x256xbf16> to vector<8x256xf32>
    %c4 = arith.constant 4 : index
    %61 = arith.index_cast %c0_i32_1 : i32 to index
    %c0_26 = arith.constant 0 : index
    %c0_27 = arith.constant 0 : index
    %62 = vector.load %arg4[%c4, %61, %c0_26, %c0_27] : memref<20x1x8x256xbf16, #tpu.memory_space<vmem>>, vector<1x1x8x256xbf16>
    %63 = vector.shape_cast %62 : vector<1x1x8x256xbf16> to vector<8x256xbf16>
    %64 = arith.extf %63 : vector<8x256xbf16> to vector<8x256xf32>
    %65 = arith.subf %60, %64 : vector<8x256xf32>
    %66 = arith.mulf %65, %65 : vector<8x256xf32>
    %67 = arith.addf %56, %66 : vector<8x256xf32>
    %c15 = arith.constant 15 : index
    %68 = arith.index_cast %c0_i32_1 : i32 to index
    %c0_28 = arith.constant 0 : index
    %c0_29 = arith.constant 0 : index
    %69 = vector.load %arg2[%c15, %68, %c0_28, %c0_29] : memref<30x1x8x256xbf16, #tpu.memory_space<vmem>>, vector<1x1x8x256xbf16>
    %70 = vector.shape_cast %69 : vector<1x1x8x256xbf16> to vector<8x256xbf16>
    %71 = arith.extf %70 : vector<8x256xbf16> to vector<8x256xf32>
    %c5 = arith.constant 5 : index
    %72 = arith.index_cast %c0_i32_1 : i32 to index
    %c0_30 = arith.constant 0 : index
    %c0_31 = arith.constant 0 : index
    %73 = vector.load %arg4[%c5, %72, %c0_30, %c0_31] : memref<20x1x8x256xbf16, #tpu.memory_space<vmem>>, vector<1x1x8x256xbf16>
    %74 = vector.shape_cast %73 : vector<1x1x8x256xbf16> to vector<8x256xbf16>
    %75 = arith.extf %74 : vector<8x256xbf16> to vector<8x256xf32>
    %76 = arith.subf %71, %75 : vector<8x256xf32>
    %77 = arith.mulf %76, %76 : vector<8x256xf32>
    %78 = arith.addf %67, %77 : vector<8x256xf32>
    %c16 = arith.constant 16 : index
    %79 = arith.index_cast %c0_i32_1 : i32 to index
    %c0_32 = arith.constant 0 : index
    %c0_33 = arith.constant 0 : index
    %80 = vector.load %arg2[%c16, %79, %c0_32, %c0_33] : memref<30x1x8x256xbf16, #tpu.memory_space<vmem>>, vector<1x1x8x256xbf16>
    %81 = vector.shape_cast %80 : vector<1x1x8x256xbf16> to vector<8x256xbf16>
    %82 = arith.extf %81 : vector<8x256xbf16> to vector<8x256xf32>
    %c6 = arith.constant 6 : index
    %83 = arith.index_cast %c0_i32_1 : i32 to index
    %c0_34 = arith.constant 0 : index
    %c0_35 = arith.constant 0 : index
    %84 = vector.load %arg4[%c6, %83, %c0_34, %c0_35] : memref<20x1x8x256xbf16, #tpu.memory_space<vmem>>, vector<1x1x8x256xbf16>
    %85 = vector.shape_cast %84 : vector<1x1x8x256xbf16> to vector<8x256xbf16>
    %86 = arith.extf %85 : vector<8x256xbf16> to vector<8x256xf32>
    %87 = arith.subf %82, %86 : vector<8x256xf32>
    %88 = arith.mulf %87, %87 : vector<8x256xf32>
    %89 = arith.addf %78, %88 : vector<8x256xf32>
    %c17 = arith.constant 17 : index
    %90 = arith.index_cast %c0_i32_1 : i32 to index
    %c0_36 = arith.constant 0 : index
    %c0_37 = arith.constant 0 : index
    %91 = vector.load %arg2[%c17, %90, %c0_36, %c0_37] : memref<30x1x8x256xbf16, #tpu.memory_space<vmem>>, vector<1x1x8x256xbf16>
    %92 = vector.shape_cast %91 : vector<1x1x8x256xbf16> to vector<8x256xbf16>
    %93 = arith.extf %92 : vector<8x256xbf16> to vector<8x256xf32>
    %c7 = arith.constant 7 : index
    %94 = arith.index_cast %c0_i32_1 : i32 to index
    %c0_38 = arith.constant 0 : index
    %c0_39 = arith.constant 0 : index
    %95 = vector.load %arg4[%c7, %94, %c0_38, %c0_39] : memref<20x1x8x256xbf16, #tpu.memory_space<vmem>>, vector<1x1x8x256xbf16>
    %96 = vector.shape_cast %95 : vector<1x1x8x256xbf16> to vector<8x256xbf16>
    %97 = arith.extf %96 : vector<8x256xbf16> to vector<8x256xf32>
    %98 = arith.subf %93, %97 : vector<8x256xf32>
    %99 = arith.mulf %98, %98 : vector<8x256xf32>
    %100 = arith.addf %89, %99 : vector<8x256xf32>
    %c18 = arith.constant 18 : index
    %101 = arith.index_cast %c0_i32_1 : i32 to index
    %c0_40 = arith.constant 0 : index
    %c0_41 = arith.constant 0 : index
    %102 = vector.load %arg2[%c18, %101, %c0_40, %c0_41] : memref<30x1x8x256xbf16, #tpu.memory_space<vmem>>, vector<1x1x8x256xbf16>
    %103 = vector.shape_cast %102 : vector<1x1x8x256xbf16> to vector<8x256xbf16>
    %104 = arith.extf %103 : vector<8x256xbf16> to vector<8x256xf32>
    %c8 = arith.constant 8 : index
    %105 = arith.index_cast %c0_i32_1 : i32 to index
    %c0_42 = arith.constant 0 : index
    %c0_43 = arith.constant 0 : index
    %106 = vector.load %arg4[%c8, %105, %c0_42, %c0_43] : memref<20x1x8x256xbf16, #tpu.memory_space<vmem>>, vector<1x1x8x256xbf16>
    %107 = vector.shape_cast %106 : vector<1x1x8x256xbf16> to vector<8x256xbf16>
    %108 = arith.extf %107 : vector<8x256xbf16> to vector<8x256xf32>
    %109 = arith.subf %104, %108 : vector<8x256xf32>
    %110 = arith.mulf %109, %109 : vector<8x256xf32>
    %111 = arith.addf %100, %110 : vector<8x256xf32>
    %c19 = arith.constant 19 : index
    %112 = arith.index_cast %c0_i32_1 : i32 to index
    %c0_44 = arith.constant 0 : index
    %c0_45 = arith.constant 0 : index
    %113 = vector.load %arg2[%c19, %112, %c0_44, %c0_45] : memref<30x1x8x256xbf16, #tpu.memory_space<vmem>>, vector<1x1x8x256xbf16>
    %114 = vector.shape_cast %113 : vector<1x1x8x256xbf16> to vector<8x256xbf16>
    %115 = arith.extf %114 : vector<8x256xbf16> to vector<8x256xf32>
    %c9 = arith.constant 9 : index
    %116 = arith.index_cast %c0_i32_1 : i32 to index
    %c0_46 = arith.constant 0 : index
    %c0_47 = arith.constant 0 : index
    %117 = vector.load %arg4[%c9, %116, %c0_46, %c0_47] : memref<20x1x8x256xbf16, #tpu.memory_space<vmem>>, vector<1x1x8x256xbf16>
    %118 = vector.shape_cast %117 : vector<1x1x8x256xbf16> to vector<8x256xbf16>
    %119 = arith.extf %118 : vector<8x256xbf16> to vector<8x256xf32>
    %120 = arith.subf %115, %119 : vector<8x256xf32>
    %121 = arith.mulf %120, %120 : vector<8x256xf32>
    %122 = arith.addf %111, %121 : vector<8x256xf32>
    %c20 = arith.constant 20 : index
    %123 = arith.index_cast %c0_i32_1 : i32 to index
    %c0_48 = arith.constant 0 : index
    %c0_49 = arith.constant 0 : index
    %124 = vector.load %arg2[%c20, %123, %c0_48, %c0_49] : memref<30x1x8x256xbf16, #tpu.memory_space<vmem>>, vector<1x1x8x256xbf16>
    %125 = vector.shape_cast %124 : vector<1x1x8x256xbf16> to vector<8x256xbf16>
    %126 = arith.extf %125 : vector<8x256xbf16> to vector<8x256xf32>
    %c10_50 = arith.constant 10 : index
    %127 = arith.index_cast %c0_i32_1 : i32 to index
    %c0_51 = arith.constant 0 : index
    %c0_52 = arith.constant 0 : index
    %128 = vector.load %arg4[%c10_50, %127, %c0_51, %c0_52] : memref<20x1x8x256xbf16, #tpu.memory_space<vmem>>, vector<1x1x8x256xbf16>
    %129 = vector.shape_cast %128 : vector<1x1x8x256xbf16> to vector<8x256xbf16>
    %130 = arith.extf %129 : vector<8x256xbf16> to vector<8x256xf32>
    %131 = arith.subf %126, %130 : vector<8x256xf32>
    %132 = arith.mulf %131, %131 : vector<8x256xf32>
    %133 = arith.addf %122, %132 : vector<8x256xf32>
    %c21 = arith.constant 21 : index
    %134 = arith.index_cast %c0_i32_1 : i32 to index
    %c0_53 = arith.constant 0 : index
    %c0_54 = arith.constant 0 : index
    %135 = vector.load %arg2[%c21, %134, %c0_53, %c0_54] : memref<30x1x8x256xbf16, #tpu.memory_space<vmem>>, vector<1x1x8x256xbf16>
    %136 = vector.shape_cast %135 : vector<1x1x8x256xbf16> to vector<8x256xbf16>
    %137 = arith.extf %136 : vector<8x256xbf16> to vector<8x256xf32>
    %c11_55 = arith.constant 11 : index
    %138 = arith.index_cast %c0_i32_1 : i32 to index
    %c0_56 = arith.constant 0 : index
    %c0_57 = arith.constant 0 : index
    %139 = vector.load %arg4[%c11_55, %138, %c0_56, %c0_57] : memref<20x1x8x256xbf16, #tpu.memory_space<vmem>>, vector<1x1x8x256xbf16>
    %140 = vector.shape_cast %139 : vector<1x1x8x256xbf16> to vector<8x256xbf16>
    %141 = arith.extf %140 : vector<8x256xbf16> to vector<8x256xf32>
    %142 = arith.subf %137, %141 : vector<8x256xf32>
    %143 = arith.mulf %142, %142 : vector<8x256xf32>
    %144 = arith.addf %133, %143 : vector<8x256xf32>
    %c22 = arith.constant 22 : index
    %145 = arith.index_cast %c0_i32_1 : i32 to index
    %c0_58 = arith.constant 0 : index
    %c0_59 = arith.constant 0 : index
    %146 = vector.load %arg2[%c22, %145, %c0_58, %c0_59] : memref<30x1x8x256xbf16, #tpu.memory_space<vmem>>, vector<1x1x8x256xbf16>
    %147 = vector.shape_cast %146 : vector<1x1x8x256xbf16> to vector<8x256xbf16>
    %148 = arith.extf %147 : vector<8x256xbf16> to vector<8x256xf32>
    %c12_60 = arith.constant 12 : index
    %149 = arith.index_cast %c0_i32_1 : i32 to index
    %c0_61 = arith.constant 0 : index
    %c0_62 = arith.constant 0 : index
    %150 = vector.load %arg4[%c12_60, %149, %c0_61, %c0_62] : memref<20x1x8x256xbf16, #tpu.memory_space<vmem>>, vector<1x1x8x256xbf16>
    %151 = vector.shape_cast %150 : vector<1x1x8x256xbf16> to vector<8x256xbf16>
    %152 = arith.extf %151 : vector<8x256xbf16> to vector<8x256xf32>
    %153 = arith.subf %148, %152 : vector<8x256xf32>
    %154 = arith.mulf %153, %153 : vector<8x256xf32>
    %155 = arith.addf %144, %154 : vector<8x256xf32>
    %c23 = arith.constant 23 : index
    %156 = arith.index_cast %c0_i32_1 : i32 to index
    %c0_63 = arith.constant 0 : index
    %c0_64 = arith.constant 0 : index
    %157 = vector.load %arg2[%c23, %156, %c0_63, %c0_64] : memref<30x1x8x256xbf16, #tpu.memory_space<vmem>>, vector<1x1x8x256xbf16>
    %158 = vector.shape_cast %157 : vector<1x1x8x256xbf16> to vector<8x256xbf16>
    %159 = arith.extf %158 : vector<8x256xbf16> to vector<8x256xf32>
    %c13_65 = arith.constant 13 : index
    %160 = arith.index_cast %c0_i32_1 : i32 to index
    %c0_66 = arith.constant 0 : index
    %c0_67 = arith.constant 0 : index
    %161 = vector.load %arg4[%c13_65, %160, %c0_66, %c0_67] : memref<20x1x8x256xbf16, #tpu.memory_space<vmem>>, vector<1x1x8x256xbf16>
    %162 = vector.shape_cast %161 : vector<1x1x8x256xbf16> to vector<8x256xbf16>
    %163 = arith.extf %162 : vector<8x256xbf16> to vector<8x256xf32>
    %164 = arith.subf %159, %163 : vector<8x256xf32>
    %165 = arith.mulf %164, %164 : vector<8x256xf32>
    %166 = arith.addf %155, %165 : vector<8x256xf32>
    %c24 = arith.constant 24 : index
    %167 = arith.index_cast %c0_i32_1 : i32 to index
    %c0_68 = arith.constant 0 : index
    %c0_69 = arith.constant 0 : index
    %168 = vector.load %arg2[%c24, %167, %c0_68, %c0_69] : memref<30x1x8x256xbf16, #tpu.memory_space<vmem>>, vector<1x1x8x256xbf16>
    %169 = vector.shape_cast %168 : vector<1x1x8x256xbf16> to vector<8x256xbf16>
    %170 = arith.extf %169 : vector<8x256xbf16> to vector<8x256xf32>
    %c14_70 = arith.constant 14 : index
    %171 = arith.index_cast %c0_i32_1 : i32 to index
    %c0_71 = arith.constant 0 : index
    %c0_72 = arith.constant 0 : index
    %172 = vector.load %arg4[%c14_70, %171, %c0_71, %c0_72] : memref<20x1x8x256xbf16, #tpu.memory_space<vmem>>, vector<1x1x8x256xbf16>
    %173 = vector.shape_cast %172 : vector<1x1x8x256xbf16> to vector<8x256xbf16>
    %174 = arith.extf %173 : vector<8x256xbf16> to vector<8x256xf32>
    %175 = arith.subf %170, %174 : vector<8x256xf32>
    %176 = arith.mulf %175, %175 : vector<8x256xf32>
    %177 = arith.addf %166, %176 : vector<8x256xf32>
    %c25 = arith.constant 25 : index
    %178 = arith.index_cast %c0_i32_1 : i32 to index
    %c0_73 = arith.constant 0 : index
    %c0_74 = arith.constant 0 : index
    %179 = vector.load %arg2[%c25, %178, %c0_73, %c0_74] : memref<30x1x8x256xbf16, #tpu.memory_space<vmem>>, vector<1x1x8x256xbf16>
    %180 = vector.shape_cast %179 : vector<1x1x8x256xbf16> to vector<8x256xbf16>
    %181 = arith.extf %180 : vector<8x256xbf16> to vector<8x256xf32>
    %c15_75 = arith.constant 15 : index
    %182 = arith.index_cast %c0_i32_1 : i32 to index
    %c0_76 = arith.constant 0 : index
    %c0_77 = arith.constant 0 : index
    %183 = vector.load %arg4[%c15_75, %182, %c0_76, %c0_77] : memref<20x1x8x256xbf16, #tpu.memory_space<vmem>>, vector<1x1x8x256xbf16>
    %184 = vector.shape_cast %183 : vector<1x1x8x256xbf16> to vector<8x256xbf16>
    %185 = arith.extf %184 : vector<8x256xbf16> to vector<8x256xf32>
    %186 = arith.subf %181, %185 : vector<8x256xf32>
    %187 = arith.mulf %186, %186 : vector<8x256xf32>
    %188 = arith.addf %177, %187 : vector<8x256xf32>
    %c26 = arith.constant 26 : index
    %189 = arith.index_cast %c0_i32_1 : i32 to index
    %c0_78 = arith.constant 0 : index
    %c0_79 = arith.constant 0 : index
    %190 = vector.load %arg2[%c26, %189, %c0_78, %c0_79] : memref<30x1x8x256xbf16, #tpu.memory_space<vmem>>, vector<1x1x8x256xbf16>
    %191 = vector.shape_cast %190 : vector<1x1x8x256xbf16> to vector<8x256xbf16>
    %192 = arith.extf %191 : vector<8x256xbf16> to vector<8x256xf32>
    %c16_80 = arith.constant 16 : index
    %193 = arith.index_cast %c0_i32_1 : i32 to index
    %c0_81 = arith.constant 0 : index
    %c0_82 = arith.constant 0 : index
    %194 = vector.load %arg4[%c16_80, %193, %c0_81, %c0_82] : memref<20x1x8x256xbf16, #tpu.memory_space<vmem>>, vector<1x1x8x256xbf16>
    %195 = vector.shape_cast %194 : vector<1x1x8x256xbf16> to vector<8x256xbf16>
    %196 = arith.extf %195 : vector<8x256xbf16> to vector<8x256xf32>
    %197 = arith.subf %192, %196 : vector<8x256xf32>
    %198 = arith.mulf %197, %197 : vector<8x256xf32>
    %199 = arith.addf %188, %198 : vector<8x256xf32>
    %c27 = arith.constant 27 : index
    %200 = arith.index_cast %c0_i32_1 : i32 to index
    %c0_83 = arith.constant 0 : index
    %c0_84 = arith.constant 0 : index
    %201 = vector.load %arg2[%c27, %200, %c0_83, %c0_84] : memref<30x1x8x256xbf16, #tpu.memory_space<vmem>>, vector<1x1x8x256xbf16>
    %202 = vector.shape_cast %201 : vector<1x1x8x256xbf16> to vector<8x256xbf16>
    %203 = arith.extf %202 : vector<8x256xbf16> to vector<8x256xf32>
    %c17_85 = arith.constant 17 : index
    %204 = arith.index_cast %c0_i32_1 : i32 to index
    %c0_86 = arith.constant 0 : index
    %c0_87 = arith.constant 0 : index
    %205 = vector.load %arg4[%c17_85, %204, %c0_86, %c0_87] : memref<20x1x8x256xbf16, #tpu.memory_space<vmem>>, vector<1x1x8x256xbf16>
    %206 = vector.shape_cast %205 : vector<1x1x8x256xbf16> to vector<8x256xbf16>
    %207 = arith.extf %206 : vector<8x256xbf16> to vector<8x256xf32>
    %208 = arith.subf %203, %207 : vector<8x256xf32>
    %209 = arith.mulf %208, %208 : vector<8x256xf32>
    %210 = arith.addf %199, %209 : vector<8x256xf32>
    %c28 = arith.constant 28 : index
    %211 = arith.index_cast %c0_i32_1 : i32 to index
    %c0_88 = arith.constant 0 : index
    %c0_89 = arith.constant 0 : index
    %212 = vector.load %arg2[%c28, %211, %c0_88, %c0_89] : memref<30x1x8x256xbf16, #tpu.memory_space<vmem>>, vector<1x1x8x256xbf16>
    %213 = vector.shape_cast %212 : vector<1x1x8x256xbf16> to vector<8x256xbf16>
    %214 = arith.extf %213 : vector<8x256xbf16> to vector<8x256xf32>
    %c18_90 = arith.constant 18 : index
    %215 = arith.index_cast %c0_i32_1 : i32 to index
    %c0_91 = arith.constant 0 : index
    %c0_92 = arith.constant 0 : index
    %216 = vector.load %arg4[%c18_90, %215, %c0_91, %c0_92] : memref<20x1x8x256xbf16, #tpu.memory_space<vmem>>, vector<1x1x8x256xbf16>
    %217 = vector.shape_cast %216 : vector<1x1x8x256xbf16> to vector<8x256xbf16>
    %218 = arith.extf %217 : vector<8x256xbf16> to vector<8x256xf32>
    %219 = arith.subf %214, %218 : vector<8x256xf32>
    %220 = arith.mulf %219, %219 : vector<8x256xf32>
    %221 = arith.addf %210, %220 : vector<8x256xf32>
    %c29 = arith.constant 29 : index
    %222 = arith.index_cast %c0_i32_1 : i32 to index
    %c0_93 = arith.constant 0 : index
    %c0_94 = arith.constant 0 : index
    %223 = vector.load %arg2[%c29, %222, %c0_93, %c0_94] : memref<30x1x8x256xbf16, #tpu.memory_space<vmem>>, vector<1x1x8x256xbf16>
    %224 = vector.shape_cast %223 : vector<1x1x8x256xbf16> to vector<8x256xbf16>
    %225 = arith.extf %224 : vector<8x256xbf16> to vector<8x256xf32>
    %c19_95 = arith.constant 19 : index
    %226 = arith.index_cast %c0_i32_1 : i32 to index
    %c0_96 = arith.constant 0 : index
    %c0_97 = arith.constant 0 : index
    %227 = vector.load %arg4[%c19_95, %226, %c0_96, %c0_97] : memref<20x1x8x256xbf16, #tpu.memory_space<vmem>>, vector<1x1x8x256xbf16>
    %228 = vector.shape_cast %227 : vector<1x1x8x256xbf16> to vector<8x256xbf16>
    %229 = arith.extf %228 : vector<8x256xbf16> to vector<8x256xf32>
    %230 = arith.subf %225, %229 : vector<8x256xf32>
    %231 = arith.mulf %230, %230 : vector<8x256xf32>
    %232 = arith.addf %221, %231 : vector<8x256xf32>
    %233 = arith.mulf %232, %7 : vector<8x256xf32>
    %c4_98 = arith.constant 4 : index
    %234 = arith.index_cast %c0_i32_1 : i32 to index
    %c0_99 = arith.constant 0 : index
    %c0_100 = arith.constant 0 : index
    %235 = vector.load %arg2[%c4_98, %234, %c0_99, %c0_100] : memref<30x1x8x256xbf16, #tpu.memory_space<vmem>>, vector<1x1x8x256xbf16>
    %236 = vector.shape_cast %235 : vector<1x1x8x256xbf16> to vector<8x256xbf16>
    %237 = arith.extf %236 : vector<8x256xbf16> to vector<8x256xf32>
    %c9_101 = arith.constant 9 : index
    %238 = arith.index_cast %c0_i32_1 : i32 to index
    %c0_102 = arith.constant 0 : index
    %c0_103 = arith.constant 0 : index
    %239 = vector.load %arg2[%c9_101, %238, %c0_102, %c0_103] : memref<30x1x8x256xbf16, #tpu.memory_space<vmem>>, vector<1x1x8x256xbf16>
    %240 = vector.shape_cast %239 : vector<1x1x8x256xbf16> to vector<8x256xbf16>
    %241 = arith.extf %240 : vector<8x256xbf16> to vector<8x256xf32>
    %242 = arith.mulf %237, %237 : vector<8x256xf32>
    %243 = arith.mulf %241, %241 : vector<8x256xf32>
    %244 = arith.addf %242, %243 : vector<8x256xf32>
    %245 = arith.mulf %244, %11 : vector<8x256xf32>
    %c0_104 = arith.constant 0 : index
    %246 = arith.index_cast %c0_i32_1 : i32 to index
    %c0_105 = arith.constant 0 : index
    %c0_106 = arith.constant 0 : index
    %247 = vector.load %arg3[%c0_104, %246, %c0_105, %c0_106] : memref<4x1x8x256xbf16, #tpu.memory_space<vmem>>, vector<1x1x8x256xbf16>
    %248 = vector.shape_cast %247 : vector<1x1x8x256xbf16> to vector<8x256xbf16>
    %249 = arith.extf %248 : vector<8x256xbf16> to vector<8x256xf32>
    %c1_107 = arith.constant 1 : index
    %250 = arith.index_cast %c0_i32_1 : i32 to index
    %c0_108 = arith.constant 0 : index
    %c0_109 = arith.constant 0 : index
    %251 = vector.load %arg3[%c1_107, %250, %c0_108, %c0_109] : memref<4x1x8x256xbf16, #tpu.memory_space<vmem>>, vector<1x1x8x256xbf16>
    %252 = vector.shape_cast %251 : vector<1x1x8x256xbf16> to vector<8x256xbf16>
    %253 = arith.extf %252 : vector<8x256xbf16> to vector<8x256xf32>
    %c2_110 = arith.constant 2 : index
    %254 = arith.index_cast %c0_i32_1 : i32 to index
    %c0_111 = arith.constant 0 : index
    %c0_112 = arith.constant 0 : index
    %255 = vector.load %arg3[%c2_110, %254, %c0_111, %c0_112] : memref<4x1x8x256xbf16, #tpu.memory_space<vmem>>, vector<1x1x8x256xbf16>
    %256 = vector.shape_cast %255 : vector<1x1x8x256xbf16> to vector<8x256xbf16>
    %257 = arith.extf %256 : vector<8x256xbf16> to vector<8x256xf32>
    %c3_113 = arith.constant 3 : index
    %258 = arith.index_cast %c0_i32_1 : i32 to index
    %c0_114 = arith.constant 0 : index
    %c0_115 = arith.constant 0 : index
    %259 = vector.load %arg3[%c3_113, %258, %c0_114, %c0_115] : memref<4x1x8x256xbf16, #tpu.memory_space<vmem>>, vector<1x1x8x256xbf16>
    %260 = vector.shape_cast %259 : vector<1x1x8x256xbf16> to vector<8x256xbf16>
    %261 = arith.extf %260 : vector<8x256xbf16> to vector<8x256xf32>
    %cst_116 = arith.constant 2.500000e-01 : f32
    %262 = vector.broadcast %cst_116 : f32 to vector<8x256xf32>
    %263 = arith.mulf %249, %262 : vector<8x256xf32>
    %cst_117 = arith.constant 2.500000e-01 : f32
    %264 = vector.broadcast %cst_117 : f32 to vector<8x256xf32>
    %265 = arith.mulf %253, %264 : vector<8x256xf32>
    %cst_118 = arith.constant 5.000000e-01 : f32
    %266 = vector.broadcast %cst_118 : f32 to vector<8x256xf32>
    %267 = arith.mulf %266, %257 : vector<8x256xf32>
    %268 = arith.subf %263, %267 : vector<8x256xf32>
    %cst_119 = arith.constant 5.000000e-01 : f32
    %269 = vector.broadcast %cst_119 : f32 to vector<8x256xf32>
    %270 = arith.mulf %269, %261 : vector<8x256xf32>
    %271 = arith.subf %265, %270 : vector<8x256xf32>
    %cst_120 = arith.constant 5.000000e-01 : f32
    %272 = vector.broadcast %cst_120 : f32 to vector<8x256xf32>
    %273 = arith.mulf %272, %257 : vector<8x256xf32>
    %274 = arith.addf %263, %273 : vector<8x256xf32>
    %cst_121 = arith.constant 5.000000e-01 : f32
    %275 = vector.broadcast %cst_121 : f32 to vector<8x256xf32>
    %276 = arith.mulf %275, %261 : vector<8x256xf32>
    %277 = arith.addf %265, %276 : vector<8x256xf32>
    %278 = arith.subf %274, %268 : vector<8x256xf32>
    %279 = arith.subf %277, %271 : vector<8x256xf32>
    %280 = arith.mulf %278, %279 : vector<8x256xf32>
    %c0_122 = arith.constant 0 : index
    %281 = arith.index_cast %c0_i32_1 : i32 to index
    %c0_123 = arith.constant 0 : index
    %c0_124 = arith.constant 0 : index
    %282 = vector.load %arg2[%c0_122, %281, %c0_123, %c0_124] : memref<30x1x8x256xbf16, #tpu.memory_space<vmem>>, vector<1x1x8x256xbf16>
    %283 = vector.shape_cast %282 : vector<1x1x8x256xbf16> to vector<8x256xbf16>
    %284 = arith.extf %283 : vector<8x256xbf16> to vector<8x256xf32>
    %c1_125 = arith.constant 1 : index
    %285 = arith.index_cast %c0_i32_1 : i32 to index
    %c0_126 = arith.constant 0 : index
    %c0_127 = arith.constant 0 : index
    %286 = vector.load %arg2[%c1_125, %285, %c0_126, %c0_127] : memref<30x1x8x256xbf16, #tpu.memory_space<vmem>>, vector<1x1x8x256xbf16>
    %287 = vector.shape_cast %286 : vector<1x1x8x256xbf16> to vector<8x256xbf16>
    %288 = arith.extf %287 : vector<8x256xbf16> to vector<8x256xf32>
    %c2_128 = arith.constant 2 : index
    %289 = arith.index_cast %c0_i32_1 : i32 to index
    %c0_129 = arith.constant 0 : index
    %c0_130 = arith.constant 0 : index
    %290 = vector.load %arg2[%c2_128, %289, %c0_129, %c0_130] : memref<30x1x8x256xbf16, #tpu.memory_space<vmem>>, vector<1x1x8x256xbf16>
    %291 = vector.shape_cast %290 : vector<1x1x8x256xbf16> to vector<8x256xbf16>
    %292 = arith.extf %291 : vector<8x256xbf16> to vector<8x256xf32>
    %c3_131 = arith.constant 3 : index
    %293 = arith.index_cast %c0_i32_1 : i32 to index
    %c0_132 = arith.constant 0 : index
    %c0_133 = arith.constant 0 : index
    %294 = vector.load %arg2[%c3_131, %293, %c0_132, %c0_133] : memref<30x1x8x256xbf16, #tpu.memory_space<vmem>>, vector<1x1x8x256xbf16>
    %295 = vector.shape_cast %294 : vector<1x1x8x256xbf16> to vector<8x256xbf16>
    %296 = arith.extf %295 : vector<8x256xbf16> to vector<8x256xf32>
    %c5_134 = arith.constant 5 : index
    %297 = arith.index_cast %c0_i32_1 : i32 to index
    %c0_135 = arith.constant 0 : index
    %c0_136 = arith.constant 0 : index
    %298 = vector.load %arg2[%c5_134, %297, %c0_135, %c0_136] : memref<30x1x8x256xbf16, #tpu.memory_space<vmem>>, vector<1x1x8x256xbf16>
    %299 = vector.shape_cast %298 : vector<1x1x8x256xbf16> to vector<8x256xbf16>
    %300 = arith.extf %299 : vector<8x256xbf16> to vector<8x256xf32>
    %c6_137 = arith.constant 6 : index
    %301 = arith.index_cast %c0_i32_1 : i32 to index
    %c0_138 = arith.constant 0 : index
    %c0_139 = arith.constant 0 : index
    %302 = vector.load %arg2[%c6_137, %301, %c0_138, %c0_139] : memref<30x1x8x256xbf16, #tpu.memory_space<vmem>>, vector<1x1x8x256xbf16>
    %303 = vector.shape_cast %302 : vector<1x1x8x256xbf16> to vector<8x256xbf16>
    %304 = arith.extf %303 : vector<8x256xbf16> to vector<8x256xf32>
    %c7_140 = arith.constant 7 : index
    %305 = arith.index_cast %c0_i32_1 : i32 to index
    %c0_141 = arith.constant 0 : index
    %c0_142 = arith.constant 0 : index
    %306 = vector.load %arg2[%c7_140, %305, %c0_141, %c0_142] : memref<30x1x8x256xbf16, #tpu.memory_space<vmem>>, vector<1x1x8x256xbf16>
    %307 = vector.shape_cast %306 : vector<1x1x8x256xbf16> to vector<8x256xbf16>
    %308 = arith.extf %307 : vector<8x256xbf16> to vector<8x256xf32>
    %c8_143 = arith.constant 8 : index
    %309 = arith.index_cast %c0_i32_1 : i32 to index
    %c0_144 = arith.constant 0 : index
    %c0_145 = arith.constant 0 : index
    %310 = vector.load %arg2[%c8_143, %309, %c0_144, %c0_145] : memref<30x1x8x256xbf16, #tpu.memory_space<vmem>>, vector<1x1x8x256xbf16>
    %311 = vector.shape_cast %310 : vector<1x1x8x256xbf16> to vector<8x256xbf16>
    %312 = arith.extf %311 : vector<8x256xbf16> to vector<8x256xf32>
    %cst_146 = arith.constant 2.500000e-01 : f32
    %313 = vector.broadcast %cst_146 : f32 to vector<8x256xf32>
    %314 = arith.mulf %284, %313 : vector<8x256xf32>
    %cst_147 = arith.constant 2.500000e-01 : f32
    %315 = vector.broadcast %cst_147 : f32 to vector<8x256xf32>
    %316 = arith.mulf %288, %315 : vector<8x256xf32>
    %cst_148 = arith.constant 5.000000e-01 : f32
    %317 = vector.broadcast %cst_148 : f32 to vector<8x256xf32>
    %318 = arith.mulf %317, %292 : vector<8x256xf32>
    %319 = arith.subf %314, %318 : vector<8x256xf32>
    %cst_149 = arith.constant 5.000000e-01 : f32
    %320 = vector.broadcast %cst_149 : f32 to vector<8x256xf32>
    %321 = arith.mulf %320, %296 : vector<8x256xf32>
    %322 = arith.subf %316, %321 : vector<8x256xf32>
    %cst_150 = arith.constant 5.000000e-01 : f32
    %323 = vector.broadcast %cst_150 : f32 to vector<8x256xf32>
    %324 = arith.mulf %323, %292 : vector<8x256xf32>
    %325 = arith.addf %314, %324 : vector<8x256xf32>
    %cst_151 = arith.constant 5.000000e-01 : f32
    %326 = vector.broadcast %cst_151 : f32 to vector<8x256xf32>
    %327 = arith.mulf %326, %296 : vector<8x256xf32>
    %328 = arith.addf %316, %327 : vector<8x256xf32>
    %329 = arith.minimumf %325, %274 : vector<8x256xf32>
    %330 = arith.maximumf %319, %268 : vector<8x256xf32>
    %331 = arith.subf %329, %330 : vector<8x256xf32>
    %cst_152 = arith.constant 0.000000e+00 : f32
    %332 = vector.broadcast %cst_152 : f32 to vector<8x256xf32>
    %333 = arith.maximumf %331, %332 : vector<8x256xf32>
    %334 = arith.minimumf %328, %277 : vector<8x256xf32>
    %335 = arith.maximumf %322, %271 : vector<8x256xf32>
    %336 = arith.subf %334, %335 : vector<8x256xf32>
    %cst_153 = arith.constant 0.000000e+00 : f32
    %337 = vector.broadcast %cst_153 : f32 to vector<8x256xf32>
    %338 = arith.maximumf %336, %337 : vector<8x256xf32>
    %339 = arith.mulf %333, %338 : vector<8x256xf32>
    %340 = arith.subf %325, %319 : vector<8x256xf32>
    %341 = arith.subf %328, %322 : vector<8x256xf32>
    %342 = arith.mulf %340, %341 : vector<8x256xf32>
    %343 = arith.addf %342, %280 : vector<8x256xf32>
    %344 = arith.subf %343, %339 : vector<8x256xf32>
    %cst_154 = arith.constant 9.99999971E-10 : f32
    %345 = vector.broadcast %cst_154 : f32 to vector<8x256xf32>
    %346 = arith.addf %344, %345 : vector<8x256xf32>
    %cst_155 = arith.constant 2.500000e-01 : f32
    %347 = vector.broadcast %cst_155 : f32 to vector<8x256xf32>
    %348 = arith.mulf %300, %347 : vector<8x256xf32>
    %cst_156 = arith.constant 2.500000e-01 : f32
    %349 = vector.broadcast %cst_156 : f32 to vector<8x256xf32>
    %350 = arith.mulf %304, %349 : vector<8x256xf32>
    %cst_157 = arith.constant 5.000000e-01 : f32
    %351 = vector.broadcast %cst_157 : f32 to vector<8x256xf32>
    %352 = arith.mulf %351, %308 : vector<8x256xf32>
    %353 = arith.subf %348, %352 : vector<8x256xf32>
    %cst_158 = arith.constant 5.000000e-01 : f32
    %354 = vector.broadcast %cst_158 : f32 to vector<8x256xf32>
    %355 = arith.mulf %354, %312 : vector<8x256xf32>
    %356 = arith.subf %350, %355 : vector<8x256xf32>
    %cst_159 = arith.constant 5.000000e-01 : f32
    %357 = vector.broadcast %cst_159 : f32 to vector<8x256xf32>
    %358 = arith.mulf %357, %308 : vector<8x256xf32>
    %359 = arith.addf %348, %358 : vector<8x256xf32>
    %cst_160 = arith.constant 5.000000e-01 : f32
    %360 = vector.broadcast %cst_160 : f32 to vector<8x256xf32>
    %361 = arith.mulf %360, %312 : vector<8x256xf32>
    %362 = arith.addf %350, %361 : vector<8x256xf32>
    %363 = arith.minimumf %359, %274 : vector<8x256xf32>
    %364 = arith.maximumf %353, %268 : vector<8x256xf32>
    %365 = arith.subf %363, %364 : vector<8x256xf32>
    %cst_161 = arith.constant 0.000000e+00 : f32
    %366 = vector.broadcast %cst_161 : f32 to vector<8x256xf32>
    %367 = arith.maximumf %365, %366 : vector<8x256xf32>
    %368 = arith.minimumf %362, %277 : vector<8x256xf32>
    %369 = arith.maximumf %356, %271 : vector<8x256xf32>
    %370 = arith.subf %368, %369 : vector<8x256xf32>
    %cst_162 = arith.constant 0.000000e+00 : f32
    %371 = vector.broadcast %cst_162 : f32 to vector<8x256xf32>
    %372 = arith.maximumf %370, %371 : vector<8x256xf32>
    %373 = arith.mulf %367, %372 : vector<8x256xf32>
    %374 = arith.subf %359, %353 : vector<8x256xf32>
    %375 = arith.subf %362, %356 : vector<8x256xf32>
    %376 = arith.mulf %374, %375 : vector<8x256xf32>
    %377 = arith.addf %376, %280 : vector<8x256xf32>
    %378 = arith.subf %377, %373 : vector<8x256xf32>
    %cst_163 = arith.constant 9.99999971E-10 : f32
    %379 = vector.broadcast %cst_163 : f32 to vector<8x256xf32>
    %380 = arith.addf %378, %379 : vector<8x256xf32>
    %381 = arith.mulf %339, %380 : vector<8x256xf32>
    %382 = arith.mulf %373, %346 : vector<8x256xf32>
    %383 = arith.cmpf ogt, %381, %382 : vector<8x256xf32>
    %384 = arith.select %383, %339, %373 : vector<8x256xi1>, vector<8x256xf32>
    %385 = arith.select %383, %346, %380 : vector<8x256xi1>, vector<8x256xf32>
    %386 = arith.divf %384, %385 : vector<8x256xf32>
    %387 = arith.select %383, %284, %300 : vector<8x256xi1>, vector<8x256xf32>
    %388 = arith.select %383, %288, %304 : vector<8x256xi1>, vector<8x256xf32>
    %389 = arith.select %383, %292, %308 : vector<8x256xi1>, vector<8x256xf32>
    %390 = arith.select %383, %296, %312 : vector<8x256xi1>, vector<8x256xf32>
    %391 = arith.select %383, %237, %241 : vector<8x256xi1>, vector<8x256xf32>
    %392 = arith.addf %387, %249 : vector<8x256xf32>
    %393 = arith.mulf %387, %249 : vector<8x256xf32>
    %394 = math.sqrt %393 : vector<8x256xf32>
    %cst_164 = arith.constant 2.000000e+00 : f32
    %395 = vector.broadcast %cst_164 : f32 to vector<8x256xf32>
    %396 = arith.mulf %395, %394 : vector<8x256xf32>
    %397 = arith.subf %392, %396 : vector<8x256xf32>
    %398 = arith.addf %397, %388 : vector<8x256xf32>
    %399 = arith.addf %398, %253 : vector<8x256xf32>
    %400 = arith.mulf %388, %253 : vector<8x256xf32>
    %401 = math.sqrt %400 : vector<8x256xf32>
    %cst_165 = arith.constant 2.000000e+00 : f32
    %402 = vector.broadcast %cst_165 : f32 to vector<8x256xf32>
    %403 = arith.mulf %402, %401 : vector<8x256xf32>
    %404 = arith.subf %399, %403 : vector<8x256xf32>
    %405 = arith.subf %389, %257 : vector<8x256xf32>
    %406 = arith.mulf %405, %405 : vector<8x256xf32>
    %407 = arith.addf %404, %406 : vector<8x256xf32>
    %408 = arith.subf %390, %261 : vector<8x256xf32>
    %409 = arith.mulf %408, %408 : vector<8x256xf32>
    %410 = arith.addf %407, %409 : vector<8x256xf32>
    %cst_166 = arith.constant 0.000000e+00 : f32
    %411 = vector.broadcast %cst_166 : f32 to vector<8x256xf32>
    %412 = arith.select %9, %410, %411 : vector<8x256xi1>, vector<8x256xf32>
    %413 = arith.subf %391, %386 : vector<8x256xf32>
    %414 = arith.mulf %413, %413 : vector<8x256xf32>
    %cst_167 = arith.constant 0.000000e+00 : f32
    %415 = vector.broadcast %cst_167 : f32 to vector<8x256xf32>
    %416 = arith.select %9, %414, %415 : vector<8x256xi1>, vector<8x256xf32>
    %417 = arith.addf %3, %233 : vector<8x256xf32>
    %418 = arith.addf %3, %245 : vector<8x256xf32>
    %419 = arith.addf %3, %412 : vector<8x256xf32>
    %420 = arith.addf %3, %416 : vector<8x256xf32>
    %c1_i32 = arith.constant 1 : i32
    %c0_168 = arith.constant 0 : index
    %c0_169 = arith.constant 0 : index
    %c0_170 = arith.constant 0 : index
    %421 = vector.load %arg6[%c0_168, %c0_169, %c0_170] : memref<4x8x256xf32, #tpu.memory_space<vmem>>, vector<1x8x256xf32>
    %422 = vector.shape_cast %421 : vector<1x8x256xf32> to vector<8x256xf32>
    %423 = arith.addf %422, %417 : vector<8x256xf32>
    %c0_171 = arith.constant 0 : index
    %c0_172 = arith.constant 0 : index
    %c0_173 = arith.constant 0 : index
    %424 = vector.load %arg6[%c0_171, %c0_172, %c0_173] : memref<4x8x256xf32, #tpu.memory_space<vmem>>, vector<1x8x256xf32>
    %425 = vector.shape_cast %424 : vector<1x8x256xf32> to vector<8x256xf32>
    %426 = vector.shape_cast %423 : vector<8x256xf32> to vector<1x8x256xf32>
    tpu.vector_store %arg6[%c0_171, %c0_172, %c0_173], %426 {strides = array<i32>} : memref<4x8x256xf32, #tpu.memory_space<vmem>>, vector<1x8x256xf32>,
    %c1_174 = arith.constant 1 : index
    %c0_175 = arith.constant 0 : index
    %c0_176 = arith.constant 0 : index
    %427 = vector.load %arg6[%c1_174, %c0_175, %c0_176] : memref<4x8x256xf32, #tpu.memory_space<vmem>>, vector<1x8x256xf32>
    %428 = vector.shape_cast %427 : vector<1x8x256xf32> to vector<8x256xf32>
    %429 = arith.addf %428, %418 : vector<8x256xf32>
    %c1_177 = arith.constant 1 : index
    %c0_178 = arith.constant 0 : index
    %c0_179 = arith.constant 0 : index
    %430 = vector.load %arg6[%c1_177, %c0_178, %c0_179] : memref<4x8x256xf32, #tpu.memory_space<vmem>>, vector<1x8x256xf32>
    %431 = vector.shape_cast %430 : vector<1x8x256xf32> to vector<8x256xf32>
    %432 = vector.shape_cast %429 : vector<8x256xf32> to vector<1x8x256xf32>
    tpu.vector_store %arg6[%c1_177, %c0_178, %c0_179], %432 {strides = array<i32>} : memref<4x8x256xf32, #tpu.memory_space<vmem>>, vector<1x8x256xf32>,
    %c2_180 = arith.constant 2 : index
    %c0_181 = arith.constant 0 : index
    %c0_182 = arith.constant 0 : index
    %433 = vector.load %arg6[%c2_180, %c0_181, %c0_182] : memref<4x8x256xf32, #tpu.memory_space<vmem>>, vector<1x8x256xf32>
    %434 = vector.shape_cast %433 : vector<1x8x256xf32> to vector<8x256xf32>
    %435 = arith.addf %434, %419 : vector<8x256xf32>
    %c2_183 = arith.constant 2 : index
    %c0_184 = arith.constant 0 : index
    %c0_185 = arith.constant 0 : index
    %436 = vector.load %arg6[%c2_183, %c0_184, %c0_185] : memref<4x8x256xf32, #tpu.memory_space<vmem>>, vector<1x8x256xf32>
    %437 = vector.shape_cast %436 : vector<1x8x256xf32> to vector<8x256xf32>
    %438 = vector.shape_cast %435 : vector<8x256xf32> to vector<1x8x256xf32>
    tpu.vector_store %arg6[%c2_183, %c0_184, %c0_185], %438 {strides = array<i32>} : memref<4x8x256xf32, #tpu.memory_space<vmem>>, vector<1x8x256xf32>,
    %c3_186 = arith.constant 3 : index
    %c0_187 = arith.constant 0 : index
    %c0_188 = arith.constant 0 : index
    %439 = vector.load %arg6[%c3_186, %c0_187, %c0_188] : memref<4x8x256xf32, #tpu.memory_space<vmem>>, vector<1x8x256xf32>
    %440 = vector.shape_cast %439 : vector<1x8x256xf32> to vector<8x256xf32>
    %441 = arith.addf %440, %420 : vector<8x256xf32>
    %c3_189 = arith.constant 3 : index
    %c0_190 = arith.constant 0 : index
    %c0_191 = arith.constant 0 : index
    %442 = vector.load %arg6[%c3_189, %c0_190, %c0_191] : memref<4x8x256xf32, #tpu.memory_space<vmem>>, vector<1x8x256xf32>
    %443 = vector.shape_cast %442 : vector<1x8x256xf32> to vector<8x256xf32>
    %444 = vector.shape_cast %441 : vector<8x256xf32> to vector<1x8x256xf32>
    tpu.vector_store %arg6[%c3_189, %c0_190, %c0_191], %444 {strides = array<i32>} : memref<4x8x256xf32, #tpu.memory_space<vmem>>, vector<1x8x256xf32>,
    return
  }
  func.func @transform_0(%arg0: i32, %arg1: i32) -> (i32, i32, i32, i32) {
    %c1_i32 = arith.constant 1 : i32
    %0 = arith.muli %arg0, %c1_i32 : i32
    %1 = arith.addi %0, %arg1 : i32
    %c0_i32 = arith.constant 0 : i32
    %c0_i32_0 = arith.constant 0 : i32
    %c0_i32_1 = arith.constant 0 : i32
    %c0_i32_2 = arith.constant 0 : i32
    return %c0_i32, %1, %c0_i32_0, %c0_i32_1 : i32, i32, i32, i32
  }
  func.func @transform_1(%arg0: i32, %arg1: i32) -> (i32, i32, i32, i32) {
    %c1_i32 = arith.constant 1 : i32
    %0 = arith.muli %arg0, %c1_i32 : i32
    %1 = arith.addi %0, %arg1 : i32
    %c0_i32 = arith.constant 0 : i32
    %c0_i32_0 = arith.constant 0 : i32
    %c0_i32_1 = arith.constant 0 : i32
    %c0_i32_2 = arith.constant 0 : i32
    return %c0_i32, %1, %c0_i32_0, %c0_i32_1 : i32, i32, i32, i32
  }
  func.func @transform_2(%arg0: i32, %arg1: i32) -> (i32, i32, i32, i32) {
    %c1_i32 = arith.constant 1 : i32
    %0 = arith.muli %arg0, %c1_i32 : i32
    %1 = arith.addi %0, %arg1 : i32
    %c0_i32 = arith.constant 0 : i32
    %c0_i32_0 = arith.constant 0 : i32
    %c0_i32_1 = arith.constant 0 : i32
    %c0_i32_2 = arith.constant 0 : i32
    return %c0_i32, %1, %c0_i32_0, %c0_i32_1 : i32, i32, i32, i32
  }
  func.func @transform_3(%arg0: i32, %arg1: i32) -> (i32, i32, i32, i32) {
    %c1_i32 = arith.constant 1 : i32
    %0 = arith.muli %arg0, %c1_i32 : i32
    %1 = arith.addi %0, %arg1 : i32
    %c0_i32 = arith.constant 0 : i32
    %c0_i32_0 = arith.constant 0 : i32
    %c0_i32_1 = arith.constant 0 : i32
    %c0_i32_2 = arith.constant 0 : i32
    return %c0_i32, %1, %c0_i32_0, %c0_i32_1 : i32, i32, i32, i32
  }
  func.func @transform_4(%arg0: i32, %arg1: i32) -> (i32, i32, i32) {
    %c0_i32 = arith.constant 0 : i32
    %c0_i32_0 = arith.constant 0 : i32
    %c0_i32_1 = arith.constant 0 : i32
    return %arg0, %c0_i32, %c0_i32_0 : i32, i32, i32
  }
}

</mosaic_0001>

<bundles_post_ra>
// kernel: yolo_loss_pallas.1
= control target key start
LH: loop header
LB: loop body
LE: loop exit
PB: predicated region body
PF: predicated region fallthrough
CT: control target
= control target key end

     0   :  { %s1549_s0 = inlined_call_operand.vmem [shape: bf16[30,1,8,256], index: 0, kind: input, shape index: {}]   ;;  %s1550_s2 = inlined_call_operand.vmem [shape: bf16[20,1,8,256], index: 2, kind: input, shape index: {}]   ;;  %s1551_s3 = inlined_call_operand.vmem [shape: bf16[1,1,8,256], index: 3, kind: input, shape index: {}]   ;;  %s1552_s1 = inlined_call_operand.vmem [shape: bf16[4,1,8,256], index: 1, kind: input, shape index: {}]   ;;  %s1553_s4 = inlined_call_operand.vmem [shape: f32[4,8,256], index: 4, kind: output, shape index: {}]  }
   0x1   :  { %v876_v0 = vld [vmem:[%s1551_s3] sm:$0xff]  ;;  %v881_v1 = vld [vmem:[%s1549_s0 + $0x50] sm:$0xff]  ;;  %v896_v6 = vld [vmem:[%s1549_s0 + $0x58] sm:$0xff] }
   0x2   :  { %v886_v2 = vld [vmem:[%s1550_s2] sm:$0xff]  ;;  %v889_v3 = vunpack.c.l.bf16 %v876_v0  ;;  %v118_v4 = vunpack.c.l.bf16 %v881_v1  ;;  %v901_v7 = vld [vmem:[%s1550_s2 + $0x8] sm:$0xff]  ;;  %v131_v9 = vunpack.c.l.bf16 %v896_v6  ;;  %v914_v12 = vld [vmem:[%s1550_s2 + $0x10] sm:$0xff] }
   0x3   :  { %v121_v5 = vunpack.c.l.bf16 %v886_v2  ;;  %v906_v8 = vld [vmem:[%s1549_s0 + $0x60] sm:$0xff]  ;;  %v135_v10 = vunpack.c.l.bf16 %v901_v7  ;;  %v919_v13 = vld [vmem:[%s1549_s0 + $0x68] sm:$0xff]  ;;  %v924_v14 = vld [vmem:[%s1550_s2 + $0x18] sm:$0xff]  ;;  %v149_v17 = vunpack.c.l.bf16 %v914_v12 }
   0x4   :  { %1576 = vst [vmem:[#allocation2_spill] sm:$0xff] %v889_v3  ;;  %v145_v11 = vunpack.c.l.bf16 %v906_v8  ;;  %v159_v18 = vunpack.c.l.bf16 %v919_v13  ;;  %v163_v19 = vunpack.c.l.bf16 %v924_v14  ;;  %v933_v20 = vld [vmem:[%s1549_s0 + $0x70] sm:$0xff]  ;;  %v938_v21 = vld [vmem:[%s1550_s2 + $0x20] sm:$0xff]  ;;  %v943_v22 = vld [vmem:[%s1549_s0 + $0x78] sm:$0xff] }
   0x5   :  { %v123_v16 = vsub.f32 %v118_v4, %v121_v5  ;;  %v137_v23 = vsub.f32 %v131_v9, %v135_v10  ;;  %v173_v24 = vunpack.c.l.bf16 %v933_v20  ;;  %v177_v25 = vunpack.c.l.bf16 %v938_v21  ;;  %v951_v27 = vld [vmem:[%s1550_s2 + $0x28] sm:$0xff]  ;;  %v956_v28 = vld [vmem:[%s1549_s0 + $0x80] sm:$0xff]  ;;  %v961_v29 = vld [vmem:[%s1550_s2 + $0x30] sm:$0xff] }
   0x6   :  { %v187_v26 = vunpack.c.l.bf16 %v943_v22  ;;  %v151_v31 = vsub.f32 %v145_v11, %v149_v17  ;;  %v165_v32 = vsub.f32 %v159_v18, %v163_v19  ;;  %v191_v33 = vunpack.c.l.bf16 %v951_v27  ;;  %v967_v34 = vld [vmem:[%s1549_s0 + $0x88] sm:$0xff]  ;;  %v972_v35 = vld [vmem:[%s1550_s2 + $0x38] sm:$0xff]  ;;  %v979_v40 = vld [vmem:[%s1549_s0 + $0x90] sm:$0xff] }
   0x7   :  { %v125_v30 = vmul.f32 %v123_v16, %v123_v16  ;;  %v139_v36 = vmul.f32 %v137_v23, %v137_v23  ;;  %v179_v37 = vsub.f32 %v173_v24, %v177_v25  ;;  %v201_v38 = vunpack.c.l.bf16 %v956_v28  ;;  %v984_v41 = vld [vmem:[%s1550_s2 + $0x40] sm:$0xff]  ;;  %v989_v42 = vld [vmem:[%s1549_s0 + $0x98] sm:$0xff]  ;;  %v995_v46 = vld [vmem:[%s1550_s2 + $0x48] sm:$0xff] }
   0x8   :  { %v205_v39 = vunpack.c.l.bf16 %v961_v29  ;;  %v153_v43 = vmul.f32 %v151_v31, %v151_v31  ;;  %v193_v44 = vsub.f32 %v187_v26, %v191_v33  ;;  %v215_v45 = vunpack.c.l.bf16 %v967_v34  ;;  %v1002_v52 = vld [vmem:[%s1549_s0 + $0xa0] sm:$0xff]  ;;  %v1007_v53 = vld [vmem:[%s1550_s2 + $0x50] sm:$0xff]  ;;  %v1012_v54 = vld [vmem:[%s1549_s0 + $0xa8] sm:$0xff] }
   0x9   :  { %v141_v48 = vadd.f32 %v139_v36, %v125_v30  ;;  %v167_v49 = vmul.f32 %v165_v32, %v165_v32  ;;  %v219_v51 = vunpack.c.l.bf16 %v972_v35  ;;  %v181_v55 = vmul.f32 %v179_v37, %v179_v37  ;;  %v1020_v59 = vld [vmem:[%s1550_s2 + $0x58] sm:$0xff]  ;;  %v1026_v4 = vld [vmem:[%s1549_s0 + $0xb0] sm:$0xff]  ;;  %v1031_v5 = vld [vmem:[%s1550_s2 + $0x60] sm:$0xff] }
   0xa   :  { %v207_v50 = vsub.f32 %v201_v38, %v205_v39  ;;  %v229_v56 = vunpack.c.l.bf16 %v979_v40  ;;  %v233_v57 = vunpack.c.l.bf16 %v984_v41  ;;  %v243_v58 = vunpack.c.l.bf16 %v989_v42  ;;  %v1039_v17 = vld [vmem:[%s1549_s0 + $0xb8] sm:$0xff]  ;;  %v1045_v25 = vld [vmem:[%s1550_s2 + $0x68] sm:$0xff]  ;;  %v1050_v26 = vld [vmem:[%s1549_s0 + $0xc0] sm:$0xff] }
   0xb   :  { %v155_v60 = vadd.f32 %v153_v43, %v141_v48  ;;  %v195_v61 = vmul.f32 %v193_v44, %v193_v44  ;;  %v221_v62 = vsub.f32 %v215_v45, %v219_v51  ;;  %v247_v63 = vunpack.c.l.bf16 %v995_v46  ;;  %v1057_v36 = vld [vmem:[%s1550_s2 + $0x70] sm:$0xff]  ;;  %v1062_v37 = vld [vmem:[%s1549_s0 + $0xc8] sm:$0xff]  ;;  %v1068_v45 = vld [vmem:[%s1550_s2 + $0x78] sm:$0xff] }
   0xc   :  { %v235_v9 = vsub.f32 %v229_v56, %v233_v57  ;;  %v257_v10 = vunpack.c.l.bf16 %v1002_v52  ;;  %v261_v11 = vunpack.c.l.bf16 %v1007_v53  ;;  %v271_v16 = vunpack.c.l.bf16 %v1012_v54  ;;  %1577 = vst [vmem:[#allocation3_spill] sm:$0xff] %v1057_v36  ;;  %v1073_v48 = vld [vmem:[%s1549_s0 + $0xd0] sm:$0xff]  ;;  %v1080_v56 = vld [vmem:[%s1550_s2 + $0x80] sm:$0xff]  ;;  %v1085_v57 = vld [vmem:[%s1549_s0 + $0xd8] sm:$0xff] }
   0xd   :  { %v169_v18 = vadd.f32 %v167_v49, %v155_v60  ;;  %v209_v19 = vmul.f32 %v207_v50, %v207_v50  ;;  %v249_v23 = vsub.f32 %v243_v58, %v247_v63  ;;  %v275_v24 = vunpack.c.l.bf16 %v1020_v59  ;;  %1578 = vst [vmem:[#allocation4_spill] sm:$0xff] %v1062_v37 }
   0xe   :  { %v223_v30 = vmul.f32 %v221_v62, %v221_v62  ;;  %v263_v31 = vsub.f32 %v257_v10, %v261_v11  ;;  %v285_v32 = vunpack.c.l.bf16 %v1026_v4  ;;  %v289_v33 = vunpack.c.l.bf16 %v1031_v5  ;;  %1579 = vst [vmem:[#allocation5_spill] sm:$0xff] %v1068_v45  ;;  %v1097_v10 = vld [vmem:[%s1549_s0 + $0xe0] sm:$0xff] }
   0xf   :  { %v183_v38 = vadd.f32 %v181_v55, %v169_v18  ;;  %v237_v39 = vmul.f32 %v235_v9, %v235_v9  ;;  %v277_v43 = vsub.f32 %v271_v16, %v275_v24  ;;  %v299_v44 = vunpack.c.l.bf16 %v1039_v17  ;;  %1580 = vst [vmem:[#allocation6_spill] sm:$0xff] %v1073_v48  ;;  %v1092_v9 = vld [vmem:[%s1550_s2 + $0x88] sm:$0xff] }
  0x10   :  { %v251_v49 = vmul.f32 %v249_v23, %v249_v23  ;;  %v291_v50 = vsub.f32 %v285_v32, %v289_v33  ;;  %v303_v51 = vunpack.c.l.bf16 %v1045_v25  ;;  %v313_v55 = vunpack.c.l.bf16 %v1050_v26  ;;  %1581 = vst [vmem:[#allocation7_spill] sm:$0xff] %v1080_v56  ;;  %v1104_v23 = vld [vmem:[%s1550_s2 + $0x90] sm:$0xff] }
  0x11   :  { %1582 = vst [vmem:[#allocation8_spill] sm:$0xff] %v1085_v57  ;;  %v197_v58 = vadd.f32 %v195_v61, %v183_v38  ;;  %v265_v60 = vmul.f32 %v263_v31, %v263_v31  ;;  %v317_v62 = vunpack.c.l.bf16 %v1057_v36  ;;  %v327_v63 = vunpack.c.l.bf16 %v1062_v37  ;;  %v1111_v38 = vld [vmem:[%s1549_s0 + $0xe8] sm:$0xff] }
  0x12   :  { %v279_v11 = vmul.f32 %v277_v43, %v277_v43  ;;  %v305_v16 = vsub.f32 %v299_v44, %v303_v51  ;;  %v331_v18 = vunpack.c.l.bf16 %v1068_v45  ;;  %v341_v61 = vunpack.c.l.bf16 %v1073_v48  ;;  %v1116_v43 = vld [vmem:[%s1550_s2 + $0x98] sm:$0xff] }
  0x13   :  { %v211_v24 = vadd.f32 %v209_v19, %v197_v58  ;;  %v319_v31 = vsub.f32 %v313_v55, %v317_v62  ;;  %v345_v32 = vunpack.c.l.bf16 %v1080_v56  ;;  %v355_v33 = vunpack.c.l.bf16 %v1085_v57 }
  0x14   :  { %v293_v44 = vmul.f32 %v291_v50, %v291_v50  ;;  %v333_v51 = vsub.f32 %v327_v63, %v331_v18  ;;  %v359_v15 = vunpack.c.l.bf16 %v1092_v9  ;;  %v369_v19 = vunpack.c.l.bf16 %v1097_v10 }
  0x15   :  { %v225_v55 = vadd.f32 %v223_v30, %v211_v24  ;;  %v307_v58 = vmul.f32 %v305_v16, %v305_v16  ;;  %v347_v62 = vsub.f32 %v341_v61, %v345_v32  ;;  %v373_v47 = vunpack.c.l.bf16 %v1104_v23 }
  0x16   :  { %v321_v3 = vmul.f32 %v319_v31, %v319_v31  ;;  %v361_v57 = vsub.f32 %v355_v33, %v359_v15  ;;  %v383_v56 = vunpack.c.l.bf16 %v1111_v38  ;;  %v387_v48 = vunpack.c.l.bf16 %v1116_v43 }
  0x17   :  { %v239_v45 = vadd.f32 %v237_v39, %v225_v55  ;;  %v335_v37 = vmul.f32 %v333_v51, %v333_v51  ;;  %v349_v36 = vmul.f32 %v347_v62, %v347_v62  ;;  %v375_v50 = vsub.f32 %v369_v19, %v373_v47 }
  0x18   :  { %v1123_v63 = vmul.f32 %v361_v57, %v361_v57  ;;  %v1126_v18 = vunpack.c.h.bf16 %v876_v0  ;;  %v1583_v30 = vunpack.c.h.bf16 %v886_v2  ;;  %v1584_v16 = vunpack.c.h.bf16 %v881_v1 }
  0x19   :  { %v132_v15 = vunpack.c.h.bf16 %v896_v6  ;;  %v253_v24 = vadd.f32 %v251_v49, %v239_v45  ;;  %v389_v31 = vsub.f32 %v383_v56, %v387_v48  ;;  %v136_v32 = vunpack.c.h.bf16 %v901_v7 }
  0x1a   :  { %v124_v61 = vsub.f32 %v1584_v16, %v1583_v30  ;;  %v146_v39 = vunpack.c.h.bf16 %v906_v8  ;;  %v1135_v33 = vmul.f32 %v375_v50, %v375_v50  ;;  %v150_v57 = vunpack.c.h.bf16 %v914_v12 }
  0x1b   :  { %v160_v0 = vunpack.c.h.bf16 %v919_v13  ;;  %v267_v51 = vadd.f32 %v265_v60, %v253_v24  ;;  %v138_v2 = vsub.f32 %v132_v15, %v136_v32  ;;  %v164_v1 = vunpack.c.h.bf16 %v924_v14 }
  0x1c   :  { %v126_v47 = vmul.f32 %v124_v61, %v124_v61  ;;  %v174_v19 = vunpack.c.h.bf16 %v933_v20  ;;  %v152_v6 = vsub.f32 %v146_v39, %v150_v57  ;;  %v178_v45 = vunpack.c.h.bf16 %v938_v21 }
  0x1d   :  { %v188_v7 = vunpack.c.h.bf16 %v943_v22  ;;  %v192_v8 = vunpack.c.h.bf16 %v951_v27  ;;  %v281_v48 = vadd.f32 %v279_v11, %v267_v51  ;;  %v140_v49 = vmul.f32 %v138_v2, %v138_v2 }
  0x1e   :  { %v166_v56 = vsub.f32 %v160_v0, %v164_v1  ;;  %v202_v12 = vunpack.c.h.bf16 %v956_v28  ;;  %v154_v55 = vmul.f32 %v152_v6, %v152_v6  ;;  %v180_v13 = vsub.f32 %v174_v19, %v178_v45 }
  0x1f   :  { %v194_v60 = vsub.f32 %v188_v7, %v192_v8  ;;  %v206_v62 = vunpack.c.h.bf16 %v961_v29  ;;  %v295_v14 = vadd.f32 %v293_v44, %v281_v48  ;;  %v142_v50 = vadd.f32 %v140_v49, %v126_v47  ;;  %v1585_v49 = vld [vmem:[#allocation3_spill] sm:$0xff] }
  0x20   :  { %v168_v20 = vmul.f32 %v166_v56, %v166_v56  ;;  %v216_v30 = vunpack.c.h.bf16 %v967_v34  ;;  %v391_v21 = vmul.f32 %v389_v31, %v389_v31  ;;  %v182_v16 = vmul.f32 %v180_v13, %v180_v13 }
  0x21   :  { %v208_v22 = vsub.f32 %v202_v12, %v206_v62  ;;  %v220_v27 = vunpack.c.h.bf16 %v972_v35  ;;  %v309_v11 = vadd.f32 %v307_v58, %v295_v14  ;;  %v156_v61 = vadd.f32 %v154_v55, %v142_v50  ;;  %v1587_v55 = vld [vmem:[#allocation5_spill] sm:$0xff]  ;;  %v1588_v14 = vld [vmem:[#allocation6_spill] sm:$0xff] }
  0x22   :  { %v230_v15 = vunpack.c.h.bf16 %v979_v40  ;;  %v234_v28 = vunpack.c.h.bf16 %v984_v41  ;;  %v196_v24 = vmul.f32 %v194_v60, %v194_v60  ;;  %v244_v29 = vunpack.c.h.bf16 %v989_v42 }
  0x23   :  { %v222_v32 = vsub.f32 %v216_v30, %v220_v27  ;;  %v248_v44 = vunpack.c.h.bf16 %v995_v46  ;;  %v323_v39 = vadd.f32 %v321_v3, %v309_v11  ;;  %v170_v47 = vadd.f32 %v168_v20, %v156_v61  ;;  %v1589_v20 = vld [vmem:[#allocation7_spill] sm:$0xff]  ;;  %v1590_v30 = vld [vmem:[#allocation8_spill] sm:$0xff] }
  0x24   :  { %v236_v34 = vsub.f32 %v230_v15, %v234_v28  ;;  %v258_v31 = vunpack.c.h.bf16 %v1002_v52  ;;  %v210_v57 = vmul.f32 %v208_v22, %v208_v22  ;;  %v262_v35 = vunpack.c.h.bf16 %v1007_v53 }
  0x25   :  { %v250_v0 = vsub.f32 %v244_v29, %v248_v44  ;;  %v272_v58 = vunpack.c.h.bf16 %v1012_v54  ;;  %v337_v40 = vadd.f32 %v335_v37, %v323_v39  ;;  %v184_v51 = vadd.f32 %v182_v16, %v170_v47  ;;  %v1591_v29 = vld [vmem:[#allocation2_spill] sm:$0xff] }
  0x26   :  { %v224_v41 = vmul.f32 %v222_v32, %v222_v32  ;;  %v276_v2 = vunpack.c.h.bf16 %v1020_v59  ;;  %v238_v1 = vmul.f32 %v236_v34, %v236_v34  ;;  %v264_v42 = vsub.f32 %v258_v31, %v262_v35  ;;  %v811_v32 = vld [vmem:[%s1549_s0 + $0x20] sm:$0xff] }
  0x27   :  { %v286_v46 = vunpack.c.h.bf16 %v1026_v4  ;;  %v290_v3 = vunpack.c.h.bf16 %v1031_v5  ;;  %v351_v19 = vadd.f32 %v349_v36, %v337_v40  ;;  %v198_v6 = vadd.f32 %v196_v24, %v184_v51  ;;  %v1586_v5 = vld [vmem:[#allocation4_spill] sm:$0xff] }
  0x28   :  { %v278_v52 = vsub.f32 %v272_v58, %v276_v2  ;;  %v300_v45 = vunpack.c.h.bf16 %v1039_v17  ;;  %v252_v7 = vmul.f32 %v250_v0, %v250_v0  ;;  %v304_v54 = vunpack.c.h.bf16 %v1045_v25  ;;  %v413_v58 = vld [vmem:[%s1552_s1] sm:$0xff] }
  0x29   :  { %v292_v53 = vsub.f32 %v286_v46, %v290_v3  ;;  %v314_v37 = vunpack.c.h.bf16 %v1050_v26  ;;  %v365_v8 = vadd.f32 %v1123_v63, %v351_v19  ;;  %v212_v59 = vadd.f32 %v210_v57, %v198_v6  ;;  %v1205_v46 = vld [vmem:[%s1552_s1 + $0x8] sm:$0xff]  ;;  %v1210_v3 = vld [vmem:[%s1552_s1 + $0x10] sm:$0xff]  ;;  %v1215_v19 = vld [vmem:[%s1552_s1 + $0x18] sm:$0xff] }
  0x2a   :  { %v266_v48 = vmul.f32 %v264_v42, %v264_v42  ;;  %v318_v56 = vunpack.c.h.bf16 %v1585_v49  ;;  %v280_v4 = vmul.f32 %v278_v52, %v278_v52  ;;  %v306_v12 = vsub.f32 %v300_v45, %v304_v54 }
  0x2b   :  { %v328_v36 = vunpack.c.h.bf16 %v1586_v5  ;;  %v332_v13 = vunpack.c.h.bf16 %v1587_v55  ;;  %v379_v17 = vadd.f32 %v1135_v33, %v365_v8  ;;  %v226_v60 = vadd.f32 %v224_v41, %v212_v59  ;;  %v1248_v5 = vld [vmem:[%s1549_s0 + $0x10] sm:$0xff] }
  0x2c   :  { %v320_v62 = vsub.f32 %v314_v37, %v318_v56  ;;  %v342_v25 = vunpack.c.h.bf16 %v1588_v14  ;;  %v294_v50 = vmul.f32 %v292_v53, %v292_v53  ;;  %v346_v63 = vunpack.c.h.bf16 %v1589_v20  ;;  %v1227_v53 = vld [vmem:[%s1549_s0] sm:$0xff] }
  0x2d   :  { %v334_v26 = vsub.f32 %v328_v36, %v332_v13  ;;  %v356_v16 = vunpack.c.h.bf16 %v1590_v30  ;;  %v393_v22 = vadd.f32 %v391_v21, %v379_v17  ;;  %v240_v27 = vadd.f32 %v238_v1, %v226_v60 }
  0x2e   :  { %v308_v11 = vmul.f32 %v306_v12, %v306_v12  ;;  %v360_v61 = vunpack.c.h.bf16 %v1092_v9  ;;  %v322_v15 = vmul.f32 %v320_v62, %v320_v62  ;;  %v348_v28 = vsub.f32 %v342_v25, %v346_v63  ;;  %v812_v9 = vld [vmem:[%s1549_s0 + $0x48] sm:$0xff] }
  0x2f   :  { %v370_v24 = vunpack.c.h.bf16 %v1097_v10  ;;  %v374_v33 = vunpack.c.h.bf16 %v1104_v23  ;;  %v395_v44 = vmul.f32 %v393_v22, %v1591_v29  ;;  %v254_v39 = vadd.f32 %v252_v7, %v240_v27  ;;  %v1243_v12 = vld [vmem:[%s1549_s0 + $0x8] sm:$0xff]  ;;  %v1272_v22 = vld [vmem:[%s1549_s0 + $0x30] sm:$0xff]  ;;  %v1277_v27 = vld [vmem:[%s1549_s0 + $0x38] sm:$0xff] }
  0x30   :  { %v362_v47 = vsub.f32 %v356_v16, %v360_v61  ;;  %v384_v21 = vunpack.c.h.bf16 %v1111_v38  ;;  %v336_v34 = vmul.f32 %v334_v26, %v334_v26  ;;  %v350_v31 = vmul.f32 %v348_v28, %v348_v28  ;;  %v1267_v16 = vld [vmem:[%s1549_s0 + $0x28] sm:$0xff]  ;;  %v1282_v28 = vld [vmem:[%s1549_s0 + $0x40] sm:$0xff] }
  0x31   :  { %v376_v57 = vsub.f32 %v370_v24, %v374_v33  ;;  %v388_v10 = vunpack.c.h.bf16 %v1116_v43  ;;  %v268_v23 = vadd.f32 %v266_v48, %v254_v39  ;;  %v114_v0 = vsub.f32 1.0, %v1591_v29  ;;  %721 = vst [vmem:[%s1553_s4] sm:$0xff] %v395_v44 }
  0x32   :  { %v1182_v35 = vunpack.c.l.bf16 %v811_v32  ;;  %v1187_v40 = vmul.f32 %v362_v47, %v362_v47  ;;  %v1191_v41 = vunpack.c.l.bf16 %v812_v9  ;;  %v1198_v1 = vunpack.c.h.bf16 %v811_v32 }
  0x33   :  { %v1189_v38 = vmul.f32 %v376_v57, %v376_v57  ;;  %v390_v51 = vsub.f32 %v384_v21, %v388_v10  ;;  %v282_v43 = vadd.f32 %v280_v4, %v268_v23  ;;  %v1200_v42 = vunpack.c.h.bf16 %v812_v9 }
  0x34   :  { %v405_v2 = vmul.f32 %v1182_v35, %v1182_v35  ;;  %v407_v52 = vmul.f32 %v1191_v41, %v1191_v41  ;;  %v115_v45 = vsub.f32 1.0, %v1126_v18  ;;  %v1222_v7 = vunpack.c.l.bf16 %v413_v58 }
  0x35   :  { %v1217_v6 = vmul.f32 %v390_v51, %v390_v51  ;;  %v296_v54 = vadd.f32 %v294_v50, %v282_v43  ;;  %v406_v37 = vmul.f32 %v1198_v1, %v1198_v1  ;;  %v408_v8 = vmul.f32 %v1200_v42, %v1200_v42  ;;  %v1260_v50 = vld [vmem:[%s1549_s0 + $0x18] sm:$0xff] }
  0x36   :  { %v1233_v59 = vunpack.c.h.bf16 %v413_v58  ;;  %v409_v48 = vadd.f32 %v407_v52, %v405_v2  ;;  %v1236_v49 = vunpack.c.l.bf16 %v1205_v46  ;;  %v1562_v56 = vunpack.c.l.bf16 %v1210_v3 }
  0x37   :  { %v1561_v4 = vunpack.c.l.bf16 %v1215_v19  ;;  %v310_v36 = vadd.f32 %v308_v11, %v296_v54  ;;  %v410_v55 = vadd.f32 %v408_v8, %v406_v37  ;;  %v428_v13 = vmul.f32 0.25, %v1222_v7 }
  0x38   :  { %v451_v17 = vunpack.c.l.bf16 %v1227_v53  ;;  %v411_v60 = vmul.f32 %v409_v48, %v114_v0  ;;  %v430_v62 = vmul.f32 0.25, %v1236_v49  ;;  %v432_v14 = vmul.f32 0.5, %v1562_v56 }
  0x39   :  { %v436_v25 = vmul.f32 0.5, %v1561_v4  ;;  %v324_v26 = vadd.f32 %v322_v15, %v310_v36  ;;  %v412_v20 = vmul.f32 %v410_v55, %v115_v45  ;;  %v455_v63 = vunpack.c.l.bf16 %v1243_v12 }
  0x3a   :  { %v1575_v30 = vunpack.c.l.bf16 %v1248_v5  ;;  %v434_v11 = vsub.f32 %v428_v13, %v432_v14  ;;  %v440_v15 = vadd.f32 %v432_v14, %v428_v13  ;;  %v1563_v32 = vunpack.c.l.bf16 %v1260_v50  ;;  %825 = vst [vmem:[%s1553_s4 + $0x10] sm:$0xff] %v411_v60 }
  0x3b   :  { %v438_v61 = vsub.f32 %v430_v62, %v436_v25  ;;  %v338_v24 = vadd.f32 %v336_v34, %v324_v26  ;;  %v442_v33 = vadd.f32 %v436_v25, %v430_v62  ;;  %v467_v39 = vunpack.c.l.bf16 %v1267_v16  ;;  %826 = vst [vmem:[%s1553_s4 + $0x18] sm:$0xff] %v412_v20 }
  0x3c   :  { %v444_v44 = vsub.f32 %v440_v15, %v434_v11  ;;  %v471_v47 = vunpack.c.l.bf16 %v1272_v22  ;;  %v475_v21 = vunpack.c.l.bf16 %v1277_v27  ;;  %v1564_v57 = vunpack.c.l.bf16 %v1282_v28 }
  0x3d   :  { %v352_v9 = vadd.f32 %v350_v31, %v338_v24  ;;  %v446_v34 = vsub.f32 %v442_v33, %v438_v61  ;;  %v481_v10 = vmul.f32 0.25, %v451_v17  ;;  %v483_v23 = vmul.f32 0.25, %v455_v63 }
  0x3e   :  { %v485_v0 = vmul.f32 0.5, %v1575_v30  ;;  %v489_v58 = vmul.f32 0.5, %v1563_v32  ;;  %v527_v31 = vmul.f32 0.25, %v467_v39  ;;  %v529_v2 = vmul.f32 0.25, %v471_v47 }
  0x3f   :  { %v366_v51 = vadd.f32 %v1187_v40, %v352_v9  ;;  %v448_v43 = vmul.f32 %v446_v34, %v444_v44  ;;  %v531_v52 = vmul.f32 0.5, %v475_v21  ;;  %v535_v55 = vmul.f32 0.5, %v1564_v57 }
  0x40   :  { %v487_v45 = vsub.f32 %v481_v10, %v485_v0  ;;  %v491_v54 = vsub.f32 %v483_v23, %v489_v58  ;;  %v493_v37 = vadd.f32 %v485_v0, %v481_v10  ;;  %v495_v8 = vadd.f32 %v489_v58, %v483_v23 }
  0x41   :  { %v380_v48 = vadd.f32 %v1189_v38, %v366_v51  ;;  %v533_v36 = vsub.f32 %v527_v31, %v531_v52  ;;  %v539_v13 = vadd.f32 %v531_v52, %v527_v31  ;;  %v537_v24 = vsub.f32 %v529_v2, %v535_v55 }
  0x42   :  { %v497_v60 = vmin.f32 %v493_v37, %v440_v15  ;;  %v499_v40 = vmax.f32 %v487_v45, %v434_v11  ;;  %v505_v62 = vmin.f32 %v495_v8, %v442_v33  ;;  %v507_v14 = vmax.f32 %v491_v54, %v438_v61 }
  0x43   :  { %v394_v25 = vadd.f32 %v1217_v6, %v380_v48  ;;  %v515_v26 = vsub.f32 %v493_v37, %v487_v45  ;;  %v517_v20 = vsub.f32 %v495_v8, %v491_v54  ;;  %v541_v34 = vadd.f32 %v535_v55, %v529_v2 }
  0x44   :  { %v501_v44 = vsub.f32 %v497_v60, %v499_v40  ;;  %v509_v9 = vsub.f32 %v505_v62, %v507_v14  ;;  %v543_v10 = vmin.f32 %v539_v13, %v440_v15  ;;  %v545_v0 = vmax.f32 %v533_v36, %v434_v11 }
  0x45   :  { %v396_v38 = vmul.f32 %v394_v25, %v1126_v18  ;;  %v519_v23 = vmul.f32 %v517_v20, %v515_v26  ;;  %v553_v58 = vmax.f32 %v537_v24, %v438_v61  ;;  %v551_v52 = vmin.f32 %v541_v34, %v442_v33 }
  0x46   :  { %v503_v51 = vmax.f32 %v501_v44, 0.0  ;;  %v511_v31 = vmax.f32 %v509_v9, 0.0  ;;  %v561_v4 = vsub.f32 %v539_v13, %v533_v36  ;;  %v547_v32 = vsub.f32 %v543_v10, %v545_v0 }
  0x47   :  { %v521_v56 = vadd.f32 %v519_v23, %v448_v43  ;;  %v563_v57 = vsub.f32 %v541_v34, %v537_v24  ;;  %v555_v45 = vsub.f32 %v551_v52, %v553_v58  ;;  %v1566_v54 = vunpack.c.h.bf16 %v1210_v3  ;;  %722 = vst [vmem:[%s1553_s4 + $0x8] sm:$0xff] %v396_v38 }
  0x48   :  { %v1315_v6 = vmul.f32 %v511_v31, %v503_v51  ;;  %v549_v15 = vmax.f32 %v547_v32, 0.0  ;;  %v1322_v11 = vunpack.c.h.bf16 %v1205_v46  ;;  %v1565_v61 = vunpack.c.h.bf16 %v1215_v19 }
  0x49   :  { %v565_v2 = vmul.f32 %v563_v57, %v561_v4  ;;  %v557_v37 = vmax.f32 %v555_v45, 0.0  ;;  %v429_v48 = vmul.f32 0.25, %v1233_v59  ;;  %v433_v36 = vmul.f32 0.5, %v1566_v54 }
  0x4a   :  { %v523_v33 = vsub.f32 %v521_v56, %v1315_v6  ;;  %v1573_v32 = vunpack.c.h.bf16 %v1227_v53  ;;  %v1569_v4 = vunpack.c.h.bf16 %v1243_v12  ;;  %v431_v46 = vmul.f32 0.25, %v1322_v11 }
  0x4b   :  { %v567_v8 = vadd.f32 %v565_v2, %v448_v43  ;;  %v1329_v13 = vmul.f32 %v557_v37, %v549_v15  ;;  %v437_v57 = vmul.f32 0.5, %v1565_v61  ;;  %v1568_v56 = vunpack.c.h.bf16 %v1248_v5 }
  0x4c   :  { %v525_v55 = vadd.f32 1e-09, %v523_v33  ;;  %v1567_v43 = vunpack.c.h.bf16 %v1260_v50  ;;  %v435_v62 = vsub.f32 %v429_v48, %v433_v36  ;;  %v441_v14 = vadd.f32 %v433_v36, %v429_v48 }
  0x4d   :  { %v569_v60 = vsub.f32 %v567_v8, %v1329_v13  ;;  %v482_v26 = vmul.f32 0.25, %v1573_v32  ;;  %v484_v20 = vmul.f32 0.25, %v1569_v4  ;;  %v486_v24 = vmul.f32 0.5, %v1568_v56 }
  0x4e   :  { %v575_v40 = vmul.f32 %v1329_v13, %v525_v55  ;;  %v439_v44 = vsub.f32 %v431_v46, %v437_v57  ;;  %v1574_v9 = vunpack.c.h.bf16 %v1267_v16  ;;  %v1572_v34 = vunpack.c.h.bf16 %v1272_v22 }
  0x4f   :  { %v571_v25 = vadd.f32 1e-09, %v569_v60  ;;  %v490_v10 = vmul.f32 0.5, %v1567_v43  ;;  %v1570_v23 = vunpack.c.h.bf16 %v1277_v27  ;;  %v488_v0 = vsub.f32 %v482_v26, %v486_v24 }
  0x50   :  { %v494_v58 = vadd.f32 %v486_v24, %v482_v26  ;;  %v443_v51 = vadd.f32 %v437_v57, %v431_v46  ;;  %v1571_v31 = vunpack.c.h.bf16 %v1282_v28  ;;  %v445_v2 = vsub.f32 %v441_v14, %v435_v62 }
  0x51   :  { %v573_v38 = vmul.f32 %v571_v25, %v1315_v6  ;;  %v492_v52 = vsub.f32 %v484_v20, %v490_v10  ;;  %v496_v45 = vadd.f32 %v490_v10, %v484_v20  ;;  %v500_v37 = vmax.f32 %v488_v0, %v435_v62 }
  0x52   :  { %v498_v33 = vmin.f32 %v494_v58, %v441_v14  ;;  %v447_v36 = vsub.f32 %v443_v51, %v439_v44  ;;  %v528_v46 = vmul.f32 0.25, %v1574_v9  ;;  %v536_v26 = vmul.f32 0.5, %v1571_v31 }
  0x53   :  { %vm1353_vm0 = vcmp.gt.f32.partialorder %v573_v38, %v575_v40  ;;  %v516_v20 = vsub.f32 %v494_v58, %v488_v0  ;;  %v518_v61 = vsub.f32 %v496_v45, %v492_v52  ;;  %vm112_vm10 = vcmp.gt.f32.partialorder %v1591_v29, 0.5 }
  0x54   :  { %v613_v8 = vsel %vm1353_vm0, %v451_v17, %v467_v39  ;;  %v1369_v48 = vsel %vm1353_vm0, %v455_v63, %v471_v47  ;;  %v530_v17 = vmul.f32 0.25, %v1572_v34  ;;  %v532_v39 = vmul.f32 0.5, %v1570_v23 }
  0x55   :  { %v1374_v57 = vmul.f32 %v613_v8, %v1222_v7  ;;  %v1378_v60 = vmul.f32 %v1369_v48, %v1236_v49  ;;  %v502_v40 = vsub.f32 %v498_v33, %v500_v37  ;;  %v506_v63 = vmin.f32 %v496_v45, %v443_v51 }
  0x56   :  { %v508_v47 = vmax.f32 %v492_v52, %v439_v44  ;;  %v449_v24 = vmul.f32 %v447_v36, %v445_v2  ;;  %v534_v54 = vsub.f32 %v528_v46, %v532_v39  ;;  %v538_v43 = vsub.f32 %v530_v17, %v536_v26 }
  0x57   :  { %836 = vrsqrt.f32 %v1374_v57  ;;  %v504_v10 = vmax.f32 %v502_v40, 0.0  ;;  %v540_v56 = vadd.f32 %v532_v39, %v528_v46  ;;  %v542_v4 = vadd.f32 %v536_v26, %v530_v17 }
  0x58   :  { %838 = vrsqrt.f32 %v1378_v60  ;;  %v510_v38 = vsub.f32 %v506_v63, %v508_v47  ;;  %v1390_v33 = vsel %vm1353_vm0, %v525_v55, %v571_v25  ;;  %v520_v23 = vmul.f32 %v518_v61, %v516_v20 }
  0x59   :  { %v546_v31 = vmax.f32 %v534_v54, %v435_v62  ;;  %v554_v34 = vmax.f32 %v538_v43, %v439_v44  ;;  %v544_v9 = vmin.f32 %v540_v56, %v441_v14  ;;  %v552_v30 = vmin.f32 %v542_v4, %v443_v51 }
  0x5a   :  { %v512_v37 = vmax.f32 %v510_v38, 0.0  ;;  %v562_v0 = vsub.f32 %v540_v56, %v534_v54  ;;  %v564_v58 = vsub.f32 %v542_v4, %v538_v43  ;;  %v522_v36 = vadd.f32 %v520_v23, %v449_v24 }
  0x5b   :  { %840 = vrcp.f32 %v1390_v33  ;;  %v548_v25 = vsub.f32 %v544_v9, %v546_v31  ;;  %v556_v46 = vsub.f32 %v552_v30, %v554_v34  ;;  %v1594_v40 = vunpack.c.l.bf16 %v1248_v5 }
  0x5c   :  { %v1393_v45 = vmul.f32 %v512_v37, %v504_v10  ;;  %v566_v61 = vmul.f32 %v564_v58, %v562_v0  ;;  %v1595_v9 = vunpack.c.l.bf16 %v1282_v28  ;;  %v1596_v34 = vunpack.c.l.bf16 %v1260_v50 }
  0x5d   :  { %v837_v32 = vpop.eup %836  ;;  %v550_v51 = vmax.f32 %v548_v25, 0.0  ;;  %v558_v54 = vmax.f32 %v556_v46, 0.0  ;;  %v617_v30 = vsel %vm1353_vm0, %v1594_v40, %v475_v21  ;;  %v623_v47 = vadd.f32 %v613_v8, %v1222_v7 }
  0x5e   :  { %v839_v2 = vpop.eup %838  ;;  %v628_v52 = vmul.f32 %v837_v32, %v1374_v57  ;;  %v524_v44 = vsub.f32 %v522_v36, %v1393_v45  ;;  %v568_v4 = vadd.f32 %v566_v61, %v449_v24  ;;  %v619_v31 = vsel %vm1353_vm0, %v1596_v34, %v1595_v9 }
  0x5f   :  { %v662_v55 = vmul.f32 %v839_v2, %v1378_v60  ;;  %v1398_v39 = vmul.f32 %v558_v54, %v550_v51  ;;  %vm634_vm1 = vcmp.eq.f32.partialorder %v1374_v57, inf  ;;  %vm636_vm2 = vcmp.eq.f32.partialorder %v1374_v57, 0.0 }
  0x60   :  { %v629_v62 = vmul.f32 %v837_v32, %v628_v52  ;;  %v526_v17 = vadd.f32 1e-09, %v524_v44  ;;  %v637_v21 = vand.u32 2147483648, %v1374_v57  ;;  %vm668_vm3 = vcmp.eq.f32.partialorder %v1378_v60, inf }
  0x61   :  { %v663_v14 = vmul.f32 %v839_v2, %v662_v55  ;;  %v841_v23 = vpop.eup %840  ;;  %v570_v20 = vsub.f32 %v568_v4, %v1398_v39  ;;  %vm670_vm4 = vcmp.eq.f32.partialorder %v1378_v60, 0.0  ;;  %v671_v7 = vand.u32 2147483648, %v1378_v60 }
  0x62   :  { %v630_v56 = vmul.f32 0.5, %v629_v62  ;;  %v584_v24 = vmul.f32 %v841_v23, %v1390_v33  ;;  %v576_v0 = vmul.f32 %v1398_v39, %v526_v17  ;;  %v594_v55 = vand.u32 2147483648, %v1390_v33 }
  0x63   :  { %v664_v43 = vmul.f32 0.5, %v663_v14  ;;  %v572_v37 = vadd.f32 1e-09, %v570_v20  ;;  %vm588_vm5 = vweird.f32 %v1390_v33  ;;  %vm589_vm6 = vweird.f32 %v841_v23 }
  0x64   :  { %v631_v63 = vsub.f32 1.5, %v630_v56  ;;  %v585_v58 = vsub.f32 1.0, %v584_v24  ;;  %v592_v25 = vand.u32 2147483647, %v1390_v33  ;;  %v1599_v54 = vunpack.c.h.bf16 %v1267_v16  ;;  %vm1452_vm8 = vmor %vm588_vm5, %vm589_vm6 }
  0x65   :  { %v665_v26 = vsub.f32 1.5, %v664_v43  ;;  %v574_v8 = vmul.f32 %v572_v37, %v1393_v45  ;;  %v1600_v4 = vunpack.c.h.bf16 %v1227_v53  ;;  %v1602_v33 = vunpack.c.h.bf16 %v1243_v12 }
  0x66   :  { %v632_v10 = vmul.f32 %v837_v32, %v631_v63  ;;  %v586_v36 = vmul.f32 %v841_v23, %v585_v58  ;;  %v1605_v16 = vunpack.c.l.bf16 %v1210_v3  ;;  %v1606_v34 = vunpack.c.l.bf16 %v1215_v19 }
  0x67   :  { %v666_v38 = vmul.f32 %v839_v2, %v665_v26  ;;  %vm1432_vm7 = vcmp.gt.f32.partialorder %v574_v8, %v576_v0  ;;  %v595_v26 = vor.u32 1.1754944e-38, %v594_v55  ;;  %vm593_vm9 = vcmp.eq.f32.partialorder %v592_v25, 8.507059e+37 }
  0x68   :  { %v633_v52 = vmul.f32 %v632_v10, %v1374_v57  ;;  %v587_v44 = vadd.f32 %v841_v23, %v586_v36  ;;  %v1442_v56 = vsel %vm1432_vm7, %v1600_v4, %v1599_v54  ;;  %v689_v53 = vsub.f32 %v617_v30, %v1605_v16 }
  0x69   :  { %v667_v32 = vmul.f32 %v666_v38, %v1378_v60  ;;  %v1460_v9 = vmul.f32 %v1442_v56, %v1233_v59  ;;  %v695_v63 = vsub.f32 %v619_v31, %v1606_v34  ;;  %v1609_v16 = vunpack.c.h.bf16 %v1277_v27 }
  0x6a   :  { %v635_v2 = vsel %vm634_vm1, %v1374_v57, %v633_v52  ;;  %v1601_v57 = vunpack.c.h.bf16 %v1272_v22  ;;  %v591_v30 = vsel %vm1452_vm8, %v841_v23, %v587_v44  ;;  %v691_v10 = vmul.f32 %v689_v53, %v689_v53 }
  0x6b   :  { %v638_v46 = vsel %vm636_vm2, %v637_v21, %v635_v2  ;;  %v669_v61 = vsel %vm668_vm3, %v1378_v60, %v667_v32  ;;  %842 = vrsqrt.f32 %v1460_v9  ;;  %v596_v31 = vsel %vm593_vm9, %v595_v26, %v591_v30 }
  0x6c   :  { %v651_v14 = vmul.f32 2.0, %v638_v46  ;;  %v672_v51 = vsel %vm670_vm4, %v671_v7, %v669_v61  ;;  %v1450_v60 = vsel %vm1432_vm7, %v1602_v33, %v1601_v57  ;;  %v582_v23 = vsel %vm1432_vm7, %v526_v17, %v572_v37 }
  0x6d   :  { %v1464_v22 = vmul.f32 %v1450_v60, %v1322_v11  ;;  %v685_v12 = vmul.f32 2.0, %v672_v51  ;;  %v697_v38 = vmul.f32 %v695_v63, %v695_v63  ;;  %vm603_vm11 = vweird.f32 %v582_v23 }
  0x6e   :  { %v653_v40 = vsub.f32 %v623_v47, %v651_v14  ;;  %v579_v47 = vsel %vm1353_vm0, %v1315_v6, %v1329_v13  ;;  %v609_v25 = vand.u32 2147483648, %v582_v23  ;;  %v607_v61 = vand.u32 2147483647, %v582_v23 }
  0x6f   :  { %844 = vrsqrt.f32 %v1464_v22  ;;  %v597_v0 = vmul.f32 %v596_v31, %v579_v47  ;;  %vm646_vm13 = vcmp.eq.f32.partialorder %v1460_v9, inf  ;;  %vm648_vm14 = vcmp.eq.f32.partialorder %v1460_v9, 0.0 }
  0x70   :  { %v655_v20 = vadd.f32 %v653_v40, %v1369_v48  ;;  %v621_v48 = vsel %vm1353_vm0, %v1182_v35, %v1191_v41  ;;  %846 = vrcp.f32 %v582_v23  ;;  %v649_v54 = vand.u32 2147483648, %v1460_v9 }
  0x71   :  { %v843_v58 = vpop.eup %842  ;;  %v703_v7 = vsub.f32 %v621_v48, %v597_v0  ;;  %v610_v33 = vor.u32 1.1754944e-38, %v609_v25  ;;  %vm680_vm0 = vcmp.eq.f32.partialorder %v1464_v22, inf  ;;  %vm608_vm1 = vcmp.eq.f32.partialorder %v607_v61, 8.507059e+37 }
  0x72   :  { %v657_v24 = vadd.f32 %v655_v20, %v1236_v49  ;;  %v640_v49 = vmul.f32 %v843_v58, %v1460_v9  ;;  %v1610_v53 = vunpack.c.h.bf16 %v1248_v5  ;;  %v683_v63 = vand.u32 2147483648, %v1464_v22 }
  0x73   :  { %v705_v15 = vmul.f32 %v703_v7, %v703_v7  ;;  %v580_v26 = vsel %vm1432_vm7, %v1393_v45, %v1398_v39  ;;  %v624_v20 = vadd.f32 %v1442_v56, %v1233_v59  ;;  %vm682_vm2 = vcmp.eq.f32.partialorder %v1464_v22, 0.0 }
  0x74   :  { %v687_v21 = vsub.f32 %v657_v24, %v685_v12  ;;  %v641_v35 = vmul.f32 %v843_v58, %v640_v49  ;;  %v618_v12 = vsel %vm1432_vm7, %v1610_v53, %v1609_v16  ;;  %v622_v59 = vsel %vm1432_vm7, %v1198_v1, %v1200_v42 }
  0x75   :  { %v845_v6 = vpop.eup %844  ;;  %v707_v37 = vsel %vm112_vm10, %v705_v15, 0.0  ;;  %v1611_v56 = vunpack.c.h.bf16 %v1282_v28  ;;  %vm113_vm3 = vcmp.gt.f32.partialorder %v1126_v18, 0.5  ;;  %v1614_v42 = vunpack.c.h.bf16 %v1215_v19 }
  0x76   :  { %v693_v52 = vadd.f32 %v691_v10, %v687_v21  ;;  %v674_v32 = vmul.f32 %v845_v6, %v1464_v22  ;;  %v847_v41 = vpop.eup %846  ;;  %v642_v36 = vmul.f32 0.5, %v641_v35  ;;  %833 = vst [vmem:[%s1553_s4 + $0x30] sm:$0xff] %v707_v37  ;;  %v1612_v10 = vunpack.c.h.bf16 %v1260_v50 }
  0x77   :  { %v599_v55 = vmul.f32 %v847_v41, %v582_v23  ;;  %vm604_vm12 = vweird.f32 %v847_v41  ;;  %v1613_v23 = vunpack.c.h.bf16 %v1210_v3 }
  0x78   :  { %v699_v13 = vadd.f32 %v697_v38, %v693_v52  ;;  %v675_v17 = vmul.f32 %v845_v6, %v674_v32  ;;  %v643_v29 = vsub.f32 1.5, %v642_v36  ;;  %vm1497_vm15 = vmor %vm603_vm11, %vm604_vm12  ;;  %v620_v31 = vsel %vm1432_vm7, %v1612_v10, %v1611_v56 }
  0x79   :  { %v600_v46 = vsub.f32 1.0, %v599_v55  ;;  %v696_v0 = vsub.f32 %v620_v31, %v1614_v42 }
  0x7a   :  { %v701_v8 = vsel %vm112_vm10, %v699_v13, 0.0  ;;  %v676_v2 = vmul.f32 0.5, %v675_v17  ;;  %v644_v14 = vmul.f32 %v843_v58, %v643_v29 }
  0x7b   :  { %829 = vst [vmem:[%s1553_s4 + $0x20] sm:$0xff] %v701_v8  ;;  %v601_v51 = vmul.f32 %v847_v41, %v600_v46  ;;  %v698_v7 = vmul.f32 %v696_v0, %v696_v0 }
  0x7c   :  { %v677_v44 = vsub.f32 1.5, %v676_v2  ;;  %v645_v43 = vmul.f32 %v644_v14, %v1460_v9 }
  0x7d   :  { %v602_v40 = vadd.f32 %v847_v41, %v601_v51 }
  0x7e   :  { %v678_v4 = vmul.f32 %v845_v6, %v677_v44  ;;  %v647_v27 = vsel %vm646_vm13, %v1460_v9, %v645_v43 }
  0x7f   :  { %v606_v5 = vsel %vm1497_vm15, %v847_v41, %v602_v40  ;;  %v650_v30 = vsel %vm648_vm14, %v649_v54, %v647_v27 }
  0x80   :  { %v679_v34 = vmul.f32 %v678_v4, %v1464_v22  ;;  %v611_v24 = vsel %vm608_vm1, %v610_v33, %v606_v5  ;;  %v652_v45 = vmul.f32 2.0, %v650_v30 }
  0x81   :  { %v612_v39 = vmul.f32 %v611_v24, %v580_v26 }
  0x82   :  { %v681_v47 = vsel %vm680_vm0, %v1464_v22, %v679_v34  ;;  %v654_v9 = vsub.f32 %v624_v20, %v652_v45  ;;  %v690_v22 = vsub.f32 %v618_v12, %v1613_v23 }
  0x83   :  { %v684_v48 = vsel %vm682_vm2, %v683_v63, %v681_v47  ;;  %v704_v21 = vsub.f32 %v622_v59, %v612_v39 }
  0x84   :  { %v656_v38 = vadd.f32 %v654_v9, %v1450_v60  ;;  %v686_v1 = vmul.f32 2.0, %v684_v48  ;;  %v692_v58 = vmul.f32 %v690_v22, %v690_v22 }
  0x85   :  { %v706_v28 = vmul.f32 %v704_v21, %v704_v21 }
  0x86   :  { %v658_v50 = vadd.f32 %v656_v38, %v1322_v11 }
  0x87   :  { %v708_v62 = vsel %vm113_vm3, %v706_v28, 0.0 }
  0x88   :  { %v688_v52 = vsub.f32 %v658_v50, %v686_v1  ;;  %834 = vst [vmem:[%s1553_s4 + $0x38] sm:$0xff] %v708_v62 }
  0x8a   :  { %v694_v3 = vadd.f32 %v692_v58, %v688_v52 }
  0x8c   :  { %v700_v6 = vadd.f32 %v698_v7, %v694_v3 }
  0x8e   :  { %v702_v18 = vsel %vm113_vm3, %v700_v6, 0.0 }
  0x8f   :  { %830 = vst [vmem:[%s1553_s4 + $0x28] sm:$0xff] %v702_v18 }

</bundles_post_ra>
